<compile_context>
chip_gen: v6e
topology: v6e:2x2x1
jax: 0.10.0
libtpu: 0.0.40
codegen_flags: <defaults>
</compile_context>

<pallas_src>
import jax
import jax.numpy as jnp
from jax import lax
from jax.experimental import pallas as pl
from jax.experimental.pallas import tpu as pltpu


def _mxu_linear(x, w_ref, b_ref):
    # y = x @ W + b with W:(in,out); f32 accumulation, f32 bias add.
    return jnp.dot(x.astype(w_ref.dtype), w_ref[...],
                   preferred_element_type=jnp.float32) + b_ref[...]


def std_dagmm_kernel(x_ref,
                     we1, be1, we2, be2, we3, be3, we4, be4,
                     wd1, bd1, wd2, bd2, wd3, bd3, wd4, bd4,
                     ws1, bs1, ws2, bs2,
                     dec_ref, zg_ref):
    x = x_ref[...]                                               # (TB, in_len) f32
    n = x.shape[1]
    n_gmm = ws2.shape[0]

    # ---------------- encoder ----------------
    h = jnp.maximum(_mxu_linear(x, we1, be1), 0.0)               # (TB, 60)
    h = jnp.maximum(_mxu_linear(h, we2, be2), 0.0)               # (TB, 30)
    h = jnp.maximum(_mxu_linear(h, we3, be3), 0.0)               # (TB, 10)
    # 10 -> 1: VPU multiply + one lane reduction (no degenerate MXU matmul).
    enc = jnp.sum(h * we4[...], axis=1, keepdims=True) + be4[...]   # (TB, 1)

    # ---------------- decoder ----------------
    # 1 -> 10: pure broadcast multiply-add on the VPU.
    h = jnp.tanh(enc * wd1[...] + bd1[...])                      # (TB, 10)
    h = jnp.tanh(_mxu_linear(h, wd2, bd2))                       # (TB, 30)
    h = jnp.tanh(_mxu_linear(h, wd3, bd3))                       # (TB, 60)
    dec = _mxu_linear(h, wd4, bd4)                               # (TB, in_len) f32
    dec_ref[...] = dec

    # --------- reconstruction features: exactly 4 lane-axis reductions ---------
    sum_x   = jnp.sum(x,         axis=1, keepdims=True)          # (TB, 1)
    sumsq_x = jnp.sum(x * x,     axis=1, keepdims=True)
    dot_xd  = jnp.sum(x * dec,   axis=1, keepdims=True)
    sumsq_d = jnp.sum(dec * dec, axis=1, keepdims=True)

    # cosine_similarity: dot / max(||x||*||dec||, eps), eps=1e-8 (product clamp).
    rec_cos = dot_xd * lax.rsqrt(jnp.maximum(sumsq_x * sumsq_d, 1e-16))
    # ||x-dec||^2 via algebra (no diff temporary), clamped against cancellation.
    sqdist = jnp.maximum(sumsq_x - 2.0 * dot_xd + sumsq_d, 0.0)
    rec_euc = jnp.sqrt(sqdist) * lax.rsqrt(jnp.maximum(sumsq_x, 1e-20))
    # one-pass unbiased variance (ddof=1); clamp guards fp cancellation.
    var = jnp.maximum(sumsq_x - sum_x * sum_x * (1.0 / n), 0.0) * (1.0 / (n - 1))
    rec_std = jnp.sqrt(var)

    # ------------- estimator (VPU; Dropout(p=0.5) is identity in eval) -------------
    # 4 -> 10 as four broadcast multiply-adds (ws1 stored (4, 10) = (in, out)).
    h = jnp.tanh(enc * ws1[0:1, :] + rec_euc * ws1[1:2, :]
                 + rec_cos * ws1[2:3, :] + rec_std * ws1[3:4, :] + bs1[...])  # (TB,10)
    # 10 -> n_gmm as n_gmm lane reductions (ws2 stored (n_gmm, 10)); stable softmax
    # with an EXACT divide so gamma rows sum to 1.
    logit_cols = [jnp.sum(h * ws2[j:j + 1, :], axis=1, keepdims=True)
                  for j in range(n_gmm)]
    logits = jnp.concatenate(logit_cols, axis=1) + bs2[...]      # (TB, n_gmm)
    m = jnp.max(logits, axis=1, keepdims=True)
    e = jnp.exp(logits - m)
    gamma = e / jnp.sum(e, axis=1, keepdims=True)

    # Single packed store of [enc | rec_euc | rec_cos | rec_std | gamma].
    zg_ref[...] = jnp.concatenate([enc, rec_euc, rec_cos, rec_std, gamma], axis=1)


def init_params(key, in_len, n_gmm=2, latent_dim=4):
    """Deterministic PyTorch-style (uniform +-1/sqrt(fan_in)) init; W stored (in, out)."""
    dims_enc = [(in_len, 60), (60, 30), (30, 10), (10, 1)]
    dims_dec = [(1, 10), (10, 30), (30, 60), (60, in_len)]
    dims_est = [(latent_dim, 10), (10, n_gmm)]
    names = (["we1", "we2", "we3", "we4"],
             ["wd1", "wd2", "wd3", "wd4"],
             ["ws1", "ws2"])
    params = {}
    for wnames, dims in zip(names, (dims_enc, dims_dec, dims_est)):
        for wname, (din, dout) in zip(wnames, dims):
            key, kw, kb = jax.random.split(key, 3)
            bound = 1.0 / (din ** 0.5)
            params[wname] = jax.random.uniform(kw, (din, dout), jnp.float32, -bound, bound)
            params["b" + wname[1:]] = jax.random.uniform(kb, (1, dout), jnp.float32, -bound, bound)
    return params


def prepare_params(params, mxu_dtype=jnp.float32):
    """Cast/transpose the 21 parameter arrays into kernel layout ONCE (reuse across calls)."""
    f32 = jnp.float32
    return (
        params["we1"].astype(mxu_dtype), params["be1"].astype(f32),
        params["we2"].astype(mxu_dtype), params["be2"].astype(f32),
        params["we3"].astype(mxu_dtype), params["be3"].astype(f32),
        params["we4"].T.astype(f32),     params["be4"].astype(f32),   # (1,10), (1,1) VPU
        params["wd1"].astype(f32),       params["bd1"].astype(f32),   # (1,10)       VPU
        params["wd2"].astype(mxu_dtype), params["bd2"].astype(f32),
        params["wd3"].astype(mxu_dtype), params["bd3"].astype(f32),
        params["wd4"].astype(mxu_dtype), params["bd4"].astype(f32),
        params["ws1"].astype(f32),       params["bs1"].astype(f32),   # (4,10)       VPU
        params["ws2"].T.astype(f32),     params["bs2"].astype(f32),   # (n_gmm,10)   VPU
    )


def _choose_tile_b(B, in_len, n_gmm):
    """Batch-tile rows from a VMEM budget (double-buffered x + dec + zg blocks)."""
    # Bytes/row of pipelined batch-tiled arrays, x2 for double buffering.
    per_row = 2 * 4 * (2 * in_len + (4 + n_gmm))
    budget = 12 * 1024 * 1024        # fits v5e's 16 MiB scoped default with headroom
    tile_b = budget // max(per_row, 1)
    tile_b = min(tile_b, 8192)
    # Keep the grid >= 2 steps when the batch allows so "parallel" can shard the
    # batch across both TensorCores (v7x megacore) and the pipeline overlaps DMA.
    if B > 16:
        tile_b = min(tile_b, pl.cdiv(B, 2))
    if tile_b >= B:
        return B                      # full-batch block (always legal)
    return max(8, (tile_b // 8) * 8)  # sublane (8) alignment for partial tiles


def std_dagmm_forward(x, kernel_args, tile_b=None):
    """Returns (enc, dec, z, gamma). `kernel_args` comes from prepare_params()."""
    B, in_len = x.shape
    assert in_len >= 2, "rec_std uses ddof=1 (torch.std default); needs in_len >= 2"
    x = x.astype(jnp.float32)
    n_gmm = kernel_args[-2].shape[0]          # ws2 stored as (n_gmm, 10)

    if tile_b is None:
        tile_b = _choose_tile_b(B, in_len, n_gmm)
    grid = (pl.cdiv(B, tile_b),)

    def _batch_spec(width):
        return pl.BlockSpec((tile_b, width), lambda i: (i, 0))

    def _param_spec(p):
        return pl.BlockSpec(p.shape, lambda i: (0, 0))   # resident across grid steps

    in_specs = [_batch_spec(in_len)] + [_param_spec(p) for p in kernel_args]
    out_shape = (
        jax.ShapeDtypeStruct((B, in_len), jnp.float32),      # dec
        jax.ShapeDtypeStruct((B, 4 + n_gmm), jnp.float32),   # packed [z | gamma]
    )
    out_specs = (_batch_spec(in_len), _batch_spec(4 + n_gmm))

    dec, zg = pl.pallas_call(
        std_dagmm_kernel,
        grid=grid,
        in_specs=in_specs,
        out_specs=out_specs,
        out_shape=out_shape,
        compiler_params=pltpu.CompilerParams(
            dimension_semantics=("parallel",),
            vmem_limit_bytes=48 * 1024 * 1024),
    )(x, *kernel_args)

    enc = zg[:, 0:1]
    z = zg[:, 0:4]
    gamma = zg[:, 4:]
    return enc, dec, z, gamma


def std_dagmm_reference(x, params):
    """Pure-JAX reference of the PyTorch forward() for correctness checks."""
    def lin(h, w, b):
        return h @ w + b
    h = jax.nn.relu(lin(x, params["we1"], params["be1"]))
    h = jax.nn.relu(lin(h, params["we2"], params["be2"]))
    h = jax.nn.relu(lin(h, params["we3"], params["be3"]))
    enc = lin(h, params["we4"], params["be4"])
    h = jnp.tanh(lin(enc, params["wd1"], params["bd1"]))
    h = jnp.tanh(lin(h, params["wd2"], params["bd2"]))
    h = jnp.tanh(lin(h, params["wd3"], params["bd3"]))
    dec = lin(h, params["wd4"], params["bd4"])
    dot = jnp.sum(x * dec, axis=1, keepdims=True)
    nx = jnp.linalg.norm(x, axis=1, keepdims=True)
    nd = jnp.linalg.norm(dec, axis=1, keepdims=True)
    rec_cos = dot / jnp.maximum(nx * nd, 1e-8)
    rec_euc = jnp.linalg.norm(x - dec, axis=1, keepdims=True) / jnp.maximum(nx, 1e-10)
    rec_std = jnp.std(x, axis=1, keepdims=True, ddof=1)
    z = jnp.concatenate([enc, rec_euc, rec_cos, rec_std], axis=1)
    h = jnp.tanh(lin(z, params["ws1"], params["bs1"]))
    gamma = jax.nn.softmax(lin(h, params["ws2"], params["bs2"]), axis=1)
    return enc, dec, z, gamma


if __name__ == "__main__":
    B, in_len = 64, 32
    n_gmm, latent_dim = 2, 4

    key = jax.random.PRNGKey(0)
    key, kx = jax.random.split(key)
    x = jax.random.normal(kx, (B, in_len), jnp.float32)
    params = init_params(key, in_len, n_gmm=n_gmm, latent_dim=latent_dim)

    # Prepare (cast/transpose) weights once; reuse across forward calls.
    kargs = prepare_params(params, mxu_dtype=jnp.float32)

    enc, dec, z, gamma = jax.block_until_ready(std_dagmm_forward(x, kargs))

    # Shape / sanity checks.
    assert enc.shape == (B, 1)
    assert dec.shape == (B, in_len)
    assert z.shape == (B, latent_dim)
    assert gamma.shape == (B, n_gmm)
    for a in (enc, dec, z, gamma):
        assert bool(jnp.all(jnp.isfinite(a)))
    # Exact-divide softmax -> rows sum to 1 to fp32 precision.
    assert bool(jnp.allclose(jnp.sum(gamma, axis=1), 1.0, atol=1e-5))
    assert bool(jnp.all(gamma >= 0.0))

    # Cross-check against the pure-JAX reference.
    r_enc, r_dec, r_z, r_gamma = std_dagmm_reference(x, params)
    assert bool(jnp.allclose(enc, r_enc, rtol=1e-3, atol=1e-3))
    assert bool(jnp.allclose(dec, r_dec, rtol=1e-3, atol=1e-3))
    assert bool(jnp.allclose(z, r_z, rtol=1e-3, atol=1e-3))
    assert bool(jnp.allclose(gamma, r_gamma, rtol=1e-3, atol=1e-3))

    print("KERNEL_OK")
</pallas_src>

<mosaic_0001>
module attributes {stable_mosaic.version = 11 : i64} {
  func.func @std_dagmm_kernel(%arg0: i32, %arg1: memref<32x32xf32, #tpu.memory_space<vmem>>, %arg2: memref<32x60xf32, #tpu.memory_space<vmem>>, %arg3: memref<1x60xf32, #tpu.memory_space<vmem>>, %arg4: memref<60x30xf32, #tpu.memory_space<vmem>>, %arg5: memref<1x30xf32, #tpu.memory_space<vmem>>, %arg6: memref<30x10xf32, #tpu.memory_space<vmem>>, %arg7: memref<1x10xf32, #tpu.memory_space<vmem>>, %arg8: memref<1x10xf32, #tpu.memory_space<vmem>>, %arg9: memref<1x1xf32, #tpu.memory_space<vmem>>, %arg10: memref<1x10xf32, #tpu.memory_space<vmem>>, %arg11: memref<1x10xf32, #tpu.memory_space<vmem>>, %arg12: memref<10x30xf32, #tpu.memory_space<vmem>>, %arg13: memref<1x30xf32, #tpu.memory_space<vmem>>, %arg14: memref<30x60xf32, #tpu.memory_space<vmem>>, %arg15: memref<1x60xf32, #tpu.memory_space<vmem>>, %arg16: memref<60x32xf32, #tpu.memory_space<vmem>>, %arg17: memref<1x32xf32, #tpu.memory_space<vmem>>, %arg18: memref<4x10xf32, #tpu.memory_space<vmem>>, %arg19: memref<1x10xf32, #tpu.memory_space<vmem>>, %arg20: memref<2x10xf32, #tpu.memory_space<vmem>>, %arg21: memref<1x2xf32, #tpu.memory_space<vmem>>, %arg22: memref<32x32xf32, #tpu.memory_space<vmem>>, %arg23: memref<32x6xf32, #tpu.memory_space<vmem>>) attributes {dimension_semantics = [#tpu.dimension_semantics<parallel>], iteration_bounds = array<i64: 2>, scalar_prefetch = 0 : i64, scratch_operands = 0 : i64, tpu.core_type = #tpu.core_type<tc>, window_params = [{transform_indices = @transform_0, window_bounds = array<i64: 32, 32>}, {pipeline_mode = #tpu.pipeline_mode<synchronous>, transform_indices = @transform_1, window_bounds = array<i64: 32, 60>}, {pipeline_mode = #tpu.pipeline_mode<synchronous>, transform_indices = @transform_2, window_bounds = array<i64: 1, 60>}, {pipeline_mode = #tpu.pipeline_mode<synchronous>, transform_indices = @transform_3, window_bounds = array<i64: 60, 30>}, {pipeline_mode = #tpu.pipeline_mode<synchronous>, transform_indices = @transform_4, window_bounds = array<i64: 1, 30>}, {pipeline_mode = #tpu.pipeline_mode<synchronous>, transform_indices = @transform_5, window_bounds = array<i64: 30, 10>}, {pipeline_mode = #tpu.pipeline_mode<synchronous>, transform_indices = @transform_6, window_bounds = array<i64: 1, 10>}, {pipeline_mode = #tpu.pipeline_mode<synchronous>, transform_indices = @transform_7, window_bounds = array<i64: 1, 10>}, {pipeline_mode = #tpu.pipeline_mode<synchronous>, transform_indices = @transform_8, window_bounds = array<i64: 1, 1>}, {pipeline_mode = #tpu.pipeline_mode<synchronous>, transform_indices = @transform_9, window_bounds = array<i64: 1, 10>}, {pipeline_mode = #tpu.pipeline_mode<synchronous>, transform_indices = @transform_10, window_bounds = array<i64: 1, 10>}, {pipeline_mode = #tpu.pipeline_mode<synchronous>, transform_indices = @transform_11, window_bounds = array<i64: 10, 30>}, {pipeline_mode = #tpu.pipeline_mode<synchronous>, transform_indices = @transform_12, window_bounds = array<i64: 1, 30>}, {pipeline_mode = #tpu.pipeline_mode<synchronous>, transform_indices = @transform_13, window_bounds = array<i64: 30, 60>}, {pipeline_mode = #tpu.pipeline_mode<synchronous>, transform_indices = @transform_14, window_bounds = array<i64: 1, 60>}, {pipeline_mode = #tpu.pipeline_mode<synchronous>, transform_indices = @transform_15, window_bounds = array<i64: 60, 32>}, {pipeline_mode = #tpu.pipeline_mode<synchronous>, transform_indices = @transform_16, window_bounds = array<i64: 1, 32>}, {pipeline_mode = #tpu.pipeline_mode<synchronous>, transform_indices = @transform_17, window_bounds = array<i64: 4, 10>}, {pipeline_mode = #tpu.pipeline_mode<synchronous>, transform_indices = @transform_18, window_bounds = array<i64: 1, 10>}, {pipeline_mode = #tpu.pipeline_mode<synchronous>, transform_indices = @transform_19, window_bounds = array<i64: 2, 10>}, {pipeline_mode = #tpu.pipeline_mode<synchronous>, transform_indices = @transform_20, window_bounds = array<i64: 1, 2>}, {transform_indices = @transform_21, window_bounds = array<i64: 32, 32>}, {transform_indices = @transform_22, window_bounds = array<i64: 32, 6>}]} {
    %c0 = arith.constant 0 : index
    %c0_0 = arith.constant 0 : index
    %0 = vector.load %arg1[%c0, %c0_0] : memref<32x32xf32, #tpu.memory_space<vmem>>, vector<32x32xf32>
    %c0_1 = arith.constant 0 : index
    %c0_2 = arith.constant 0 : index
    %1 = vector.load %arg2[%c0_1, %c0_2] : memref<32x60xf32, #tpu.memory_space<vmem>>, vector<32x60xf32>
    %cst = arith.constant dense<0.000000e+00> : vector<32x60xf32>
    %2 = tpu.matmul %0, %1, %cst {dimension_numbers = #tpu.dot_dimension_numbers<[1], [0], [0], [1], [0, 0, 1, 1], [], []>} : vector<32x32xf32>, vector<32x60xf32>, vector<32x60xf32> -> vector<32x60xf32>
    %c0_3 = arith.constant 0 : index
    %c0_4 = arith.constant 0 : index
    %3 = vector.load %arg3[%c0_3, %c0_4] : memref<1x60xf32, #tpu.memory_space<vmem>>, vector<1x60xf32>
    %4 = vector.broadcast %3 : vector<1x60xf32> to vector<32x60xf32>
    %5 = arith.addf %2, %4 : vector<32x60xf32>
    %cst_5 = arith.constant 0.000000e+00 : f32
    %6 = vector.broadcast %cst_5 : f32 to vector<32x60xf32>
    %7 = arith.maximumf %5, %6 : vector<32x60xf32>
    %c0_6 = arith.constant 0 : index
    %c0_7 = arith.constant 0 : index
    %8 = vector.load %arg4[%c0_6, %c0_7] : memref<60x30xf32, #tpu.memory_space<vmem>>, vector<60x30xf32>
    %cst_8 = arith.constant dense<0.000000e+00> : vector<32x30xf32>
    %9 = tpu.matmul %7, %8, %cst_8 {dimension_numbers = #tpu.dot_dimension_numbers<[1], [0], [0], [1], [0, 0, 1, 1], [], []>} : vector<32x60xf32>, vector<60x30xf32>, vector<32x30xf32> -> vector<32x30xf32>
    %c0_9 = arith.constant 0 : index
    %c0_10 = arith.constant 0 : index
    %10 = vector.load %arg5[%c0_9, %c0_10] : memref<1x30xf32, #tpu.memory_space<vmem>>, vector<1x30xf32>
    %11 = vector.broadcast %10 : vector<1x30xf32> to vector<32x30xf32>
    %12 = arith.addf %9, %11 : vector<32x30xf32>
    %cst_11 = arith.constant 0.000000e+00 : f32
    %13 = vector.broadcast %cst_11 : f32 to vector<32x30xf32>
    %14 = arith.maximumf %12, %13 : vector<32x30xf32>
    %c0_12 = arith.constant 0 : index
    %c0_13 = arith.constant 0 : index
    %15 = vector.load %arg6[%c0_12, %c0_13] : memref<30x10xf32, #tpu.memory_space<vmem>>, vector<30x10xf32>
    %cst_14 = arith.constant dense<0.000000e+00> : vector<32x10xf32>
    %16 = tpu.matmul %14, %15, %cst_14 {dimension_numbers = #tpu.dot_dimension_numbers<[1], [0], [0], [1], [0, 0, 1, 1], [], []>} : vector<32x30xf32>, vector<30x10xf32>, vector<32x10xf32> -> vector<32x10xf32>
    %c0_15 = arith.constant 0 : index
    %c0_16 = arith.constant 0 : index
    %17 = vector.load %arg7[%c0_15, %c0_16] : memref<1x10xf32, #tpu.memory_space<vmem>>, vector<1x10xf32>
    %18 = vector.broadcast %17 : vector<1x10xf32> to vector<32x10xf32>
    %19 = arith.addf %16, %18 : vector<32x10xf32>
    %cst_17 = arith.constant 0.000000e+00 : f32
    %20 = vector.broadcast %cst_17 : f32 to vector<32x10xf32>
    %21 = arith.maximumf %19, %20 : vector<32x10xf32>
    %c0_18 = arith.constant 0 : index
    %c0_19 = arith.constant 0 : index
    %22 = vector.load %arg8[%c0_18, %c0_19] : memref<1x10xf32, #tpu.memory_space<vmem>>, vector<1x10xf32>
    %23 = vector.broadcast %22 : vector<1x10xf32> to vector<32x10xf32>
    %24 = arith.mulf %21, %23 : vector<32x10xf32>
    %cst_20 = arith.constant dense<0.000000e+00> : vector<32xf32>
    %25 = vector.multi_reduction <add>, %24, %cst_20 [1] : vector<32x10xf32> to vector<32xf32>
    %26 = vector.shape_cast %25 : vector<32xf32> to vector<32x1xf32>
    %c0_21 = arith.constant 0 : index
    %c0_22 = arith.constant 0 : index
    %27 = vector.load %arg9[%c0_21, %c0_22] : memref<1x1xf32, #tpu.memory_space<vmem>>, vector<1x1xf32>
    %28 = vector.broadcast %27 : vector<1x1xf32> to vector<32x1xf32>
    %29 = arith.addf %26, %28 : vector<32x1xf32>
    %c0_23 = arith.constant 0 : index
    %c0_24 = arith.constant 0 : index
    %30 = vector.load %arg10[%c0_23, %c0_24] : memref<1x10xf32, #tpu.memory_space<vmem>>, vector<1x10xf32>
    %31 = vector.broadcast %29 : vector<32x1xf32> to vector<32x10xf32>
    %32 = vector.broadcast %30 : vector<1x10xf32> to vector<32x10xf32>
    %33 = arith.mulf %31, %32 : vector<32x10xf32>
    %c0_25 = arith.constant 0 : index
    %c0_26 = arith.constant 0 : index
    %34 = vector.load %arg11[%c0_25, %c0_26] : memref<1x10xf32, #tpu.memory_space<vmem>>, vector<1x10xf32>
    %35 = vector.broadcast %34 : vector<1x10xf32> to vector<32x10xf32>
    %36 = arith.addf %33, %35 : vector<32x10xf32>
    %37 = math.tanh %36 : vector<32x10xf32>
    %c0_27 = arith.constant 0 : index
    %c0_28 = arith.constant 0 : index
    %38 = vector.load %arg12[%c0_27, %c0_28] : memref<10x30xf32, #tpu.memory_space<vmem>>, vector<10x30xf32>
    %cst_29 = arith.constant dense<0.000000e+00> : vector<32x30xf32>
    %39 = tpu.matmul %37, %38, %cst_29 {dimension_numbers = #tpu.dot_dimension_numbers<[1], [0], [0], [1], [0, 0, 1, 1], [], []>} : vector<32x10xf32>, vector<10x30xf32>, vector<32x30xf32> -> vector<32x30xf32>
    %c0_30 = arith.constant 0 : index
    %c0_31 = arith.constant 0 : index
    %40 = vector.load %arg13[%c0_30, %c0_31] : memref<1x30xf32, #tpu.memory_space<vmem>>, vector<1x30xf32>
    %41 = vector.broadcast %40 : vector<1x30xf32> to vector<32x30xf32>
    %42 = arith.addf %39, %41 : vector<32x30xf32>
    %43 = math.tanh %42 : vector<32x30xf32>
    %c0_32 = arith.constant 0 : index
    %c0_33 = arith.constant 0 : index
    %44 = vector.load %arg14[%c0_32, %c0_33] : memref<30x60xf32, #tpu.memory_space<vmem>>, vector<30x60xf32>
    %cst_34 = arith.constant dense<0.000000e+00> : vector<32x60xf32>
    %45 = tpu.matmul %43, %44, %cst_34 {dimension_numbers = #tpu.dot_dimension_numbers<[1], [0], [0], [1], [0, 0, 1, 1], [], []>} : vector<32x30xf32>, vector<30x60xf32>, vector<32x60xf32> -> vector<32x60xf32>
    %c0_35 = arith.constant 0 : index
    %c0_36 = arith.constant 0 : index
    %46 = vector.load %arg15[%c0_35, %c0_36] : memref<1x60xf32, #tpu.memory_space<vmem>>, vector<1x60xf32>
    %47 = vector.broadcast %46 : vector<1x60xf32> to vector<32x60xf32>
    %48 = arith.addf %45, %47 : vector<32x60xf32>
    %49 = math.tanh %48 : vector<32x60xf32>
    %c0_37 = arith.constant 0 : index
    %c0_38 = arith.constant 0 : index
    %50 = vector.load %arg16[%c0_37, %c0_38] : memref<60x32xf32, #tpu.memory_space<vmem>>, vector<60x32xf32>
    %cst_39 = arith.constant dense<0.000000e+00> : vector<32x32xf32>
    %51 = tpu.matmul %49, %50, %cst_39 {dimension_numbers = #tpu.dot_dimension_numbers<[1], [0], [0], [1], [0, 0, 1, 1], [], []>} : vector<32x60xf32>, vector<60x32xf32>, vector<32x32xf32> -> vector<32x32xf32>
    %c0_40 = arith.constant 0 : index
    %c0_41 = arith.constant 0 : index
    %52 = vector.load %arg17[%c0_40, %c0_41] : memref<1x32xf32, #tpu.memory_space<vmem>>, vector<1x32xf32>
    %53 = vector.broadcast %52 : vector<1x32xf32> to vector<32x32xf32>
    %54 = arith.addf %51, %53 : vector<32x32xf32>
    %c0_42 = arith.constant 0 : index
    %c0_43 = arith.constant 0 : index
    %55 = vector.load %arg22[%c0_42, %c0_43] : memref<32x32xf32, #tpu.memory_space<vmem>>, vector<32x32xf32>
    tpu.vector_store %arg22[%c0_42, %c0_43], %54 {strides = array<i32>} : memref<32x32xf32, #tpu.memory_space<vmem>>, vector<32x32xf32>,
    %cst_44 = arith.constant dense<0.000000e+00> : vector<32xf32>
    %56 = vector.multi_reduction <add>, %0, %cst_44 [1] : vector<32x32xf32> to vector<32xf32>
    %57 = vector.shape_cast %56 : vector<32xf32> to vector<32x1xf32>
    %58 = arith.mulf %0, %0 : vector<32x32xf32>
    %cst_45 = arith.constant dense<0.000000e+00> : vector<32xf32>
    %59 = vector.multi_reduction <add>, %58, %cst_45 [1] : vector<32x32xf32> to vector<32xf32>
    %60 = vector.shape_cast %59 : vector<32xf32> to vector<32x1xf32>
    %61 = arith.mulf %0, %54 : vector<32x32xf32>
    %cst_46 = arith.constant dense<0.000000e+00> : vector<32xf32>
    %62 = vector.multi_reduction <add>, %61, %cst_46 [1] : vector<32x32xf32> to vector<32xf32>
    %63 = vector.shape_cast %62 : vector<32xf32> to vector<32x1xf32>
    %64 = arith.mulf %54, %54 : vector<32x32xf32>
    %cst_47 = arith.constant dense<0.000000e+00> : vector<32xf32>
    %65 = vector.multi_reduction <add>, %64, %cst_47 [1] : vector<32x32xf32> to vector<32xf32>
    %66 = vector.shape_cast %65 : vector<32xf32> to vector<32x1xf32>
    %67 = arith.mulf %60, %66 : vector<32x1xf32>
    %cst_48 = arith.constant 1.000000e-16 : f32
    %68 = vector.broadcast %cst_48 : f32 to vector<32x1xf32>
    %69 = arith.maximumf %67, %68 : vector<32x1xf32>
    %70 = math.rsqrt %69 : vector<32x1xf32>
    %71 = arith.mulf %63, %70 : vector<32x1xf32>
    %cst_49 = arith.constant 2.000000e+00 : f32
    %72 = vector.broadcast %cst_49 : f32 to vector<32x1xf32>
    %73 = arith.mulf %72, %63 : vector<32x1xf32>
    %74 = arith.subf %60, %73 : vector<32x1xf32>
    %75 = arith.addf %74, %66 : vector<32x1xf32>
    %cst_50 = arith.constant 0.000000e+00 : f32
    %76 = vector.broadcast %cst_50 : f32 to vector<32x1xf32>
    %77 = arith.maximumf %75, %76 : vector<32x1xf32>
    %78 = math.sqrt %77 : vector<32x1xf32>
    %cst_51 = arith.constant 9.99999968E-21 : f32
    %79 = vector.broadcast %cst_51 : f32 to vector<32x1xf32>
    %80 = arith.maximumf %60, %79 : vector<32x1xf32>
    %81 = math.rsqrt %80 : vector<32x1xf32>
    %82 = arith.mulf %78, %81 : vector<32x1xf32>
    %83 = arith.mulf %57, %57 : vector<32x1xf32>
    %cst_52 = arith.constant 3.125000e-02 : f32
    %84 = vector.broadcast %cst_52 : f32 to vector<32x1xf32>
    %85 = arith.mulf %83, %84 : vector<32x1xf32>
    %86 = arith.subf %60, %85 : vector<32x1xf32>
    %cst_53 = arith.constant 0.000000e+00 : f32
    %87 = vector.broadcast %cst_53 : f32 to vector<32x1xf32>
    %88 = arith.maximumf %86, %87 : vector<32x1xf32>
    %cst_54 = arith.constant 0.0322580636 : f32
    %89 = vector.broadcast %cst_54 : f32 to vector<32x1xf32>
    %90 = arith.mulf %88, %89 : vector<32x1xf32>
    %91 = math.sqrt %90 : vector<32x1xf32>
    %c0_55 = arith.constant 0 : index
    %c0_56 = arith.constant 0 : index
    %92 = vector.load %arg18[%c0_55, %c0_56] : memref<4x10xf32, #tpu.memory_space<vmem>>, vector<1x10xf32>
    %93 = vector.broadcast %29 : vector<32x1xf32> to vector<32x10xf32>
    %94 = vector.broadcast %92 : vector<1x10xf32> to vector<32x10xf32>
    %95 = arith.mulf %93, %94 : vector<32x10xf32>
    %c1 = arith.constant 1 : index
    %c0_57 = arith.constant 0 : index
    %96 = vector.load %arg18[%c1, %c0_57] : memref<4x10xf32, #tpu.memory_space<vmem>>, vector<1x10xf32>
    %97 = vector.broadcast %82 : vector<32x1xf32> to vector<32x10xf32>
    %98 = vector.broadcast %96 : vector<1x10xf32> to vector<32x10xf32>
    %99 = arith.mulf %97, %98 : vector<32x10xf32>
    %100 = arith.addf %95, %99 : vector<32x10xf32>
    %c2 = arith.constant 2 : index
    %c0_58 = arith.constant 0 : index
    %101 = vector.load %arg18[%c2, %c0_58] : memref<4x10xf32, #tpu.memory_space<vmem>>, vector<1x10xf32>
    %102 = vector.broadcast %71 : vector<32x1xf32> to vector<32x10xf32>
    %103 = vector.broadcast %101 : vector<1x10xf32> to vector<32x10xf32>
    %104 = arith.mulf %102, %103 : vector<32x10xf32>
    %105 = arith.addf %100, %104 : vector<32x10xf32>
    %c3 = arith.constant 3 : index
    %c0_59 = arith.constant 0 : index
    %106 = vector.load %arg18[%c3, %c0_59] : memref<4x10xf32, #tpu.memory_space<vmem>>, vector<1x10xf32>
    %107 = vector.broadcast %91 : vector<32x1xf32> to vector<32x10xf32>
    %108 = vector.broadcast %106 : vector<1x10xf32> to vector<32x10xf32>
    %109 = arith.mulf %107, %108 : vector<32x10xf32>
    %110 = arith.addf %105, %109 : vector<32x10xf32>
    %c0_60 = arith.constant 0 : index
    %c0_61 = arith.constant 0 : index
    %111 = vector.load %arg19[%c0_60, %c0_61] : memref<1x10xf32, #tpu.memory_space<vmem>>, vector<1x10xf32>
    %112 = vector.broadcast %111 : vector<1x10xf32> to vector<32x10xf32>
    %113 = arith.addf %110, %112 : vector<32x10xf32>
    %114 = math.tanh %113 : vector<32x10xf32>
    %c0_62 = arith.constant 0 : index
    %c0_63 = arith.constant 0 : index
    %115 = vector.load %arg20[%c0_62, %c0_63] : memref<2x10xf32, #tpu.memory_space<vmem>>, vector<1x10xf32>
    %116 = vector.broadcast %115 : vector<1x10xf32> to vector<32x10xf32>
    %117 = arith.mulf %114, %116 : vector<32x10xf32>
    %cst_64 = arith.constant dense<0.000000e+00> : vector<32xf32>
    %118 = vector.multi_reduction <add>, %117, %cst_64 [1] : vector<32x10xf32> to vector<32xf32>
    %119 = vector.shape_cast %118 : vector<32xf32> to vector<32x1xf32>
    %c1_65 = arith.constant 1 : index
    %c0_66 = arith.constant 0 : index
    %120 = vector.load %arg20[%c1_65, %c0_66] : memref<2x10xf32, #tpu.memory_space<vmem>>, vector<1x10xf32>
    %121 = vector.broadcast %120 : vector<1x10xf32> to vector<32x10xf32>
    %122 = arith.mulf %114, %121 : vector<32x10xf32>
    %cst_67 = arith.constant dense<0.000000e+00> : vector<32xf32>
    %123 = vector.multi_reduction <add>, %122, %cst_67 [1] : vector<32x10xf32> to vector<32xf32>
    %124 = vector.shape_cast %123 : vector<32xf32> to vector<32x1xf32>
    %125 = tpu.concatenate %119, %124 in 1 : vector<32x1xf32>, vector<32x1xf32> -> vector<32x2xf32>
    %c0_68 = arith.constant 0 : index
    %c0_69 = arith.constant 0 : index
    %126 = vector.load %arg21[%c0_68, %c0_69] : memref<1x2xf32, #tpu.memory_space<vmem>>, vector<1x2xf32>
    %127 = vector.broadcast %126 : vector<1x2xf32> to vector<32x2xf32>
    %128 = arith.addf %125, %127 : vector<32x2xf32>
    %cst_70 = arith.constant dense<0xFF800000> : vector<32xf32>
    %129 = vector.multi_reduction <maximumf>, %128, %cst_70 [1] : vector<32x2xf32> to vector<32xf32>
    %130 = vector.shape_cast %129 : vector<32xf32> to vector<32x1xf32>
    %131 = vector.broadcast %130 : vector<32x1xf32> to vector<32x2xf32>
    %132 = arith.subf %128, %131 : vector<32x2xf32>
    %133 = math.exp %132 : vector<32x2xf32>
    %cst_71 = arith.constant dense<0.000000e+00> : vector<32xf32>
    %134 = vector.multi_reduction <add>, %133, %cst_71 [1] : vector<32x2xf32> to vector<32xf32>
    %135 = vector.shape_cast %134 : vector<32xf32> to vector<32x1xf32>
    %136 = vector.broadcast %135 : vector<32x1xf32> to vector<32x2xf32>
    %137 = arith.divf %133, %136 : vector<32x2xf32>
    %138 = tpu.concatenate %29, %82, %71, %91, %137 in 1 : vector<32x1xf32>, vector<32x1xf32>, vector<32x1xf32>, vector<32x1xf32>, vector<32x2xf32> -> vector<32x6xf32>
    %c0_72 = arith.constant 0 : index
    %c0_73 = arith.constant 0 : index
    %139 = vector.load %arg23[%c0_72, %c0_73] : memref<32x6xf32, #tpu.memory_space<vmem>>, vector<32x6xf32>
    tpu.vector_store %arg23[%c0_72, %c0_73], %138 {strides = array<i32>} : memref<32x6xf32, #tpu.memory_space<vmem>>, vector<32x6xf32>,
    return
  }
  func.func @transform_0(%arg0: i32) -> (i32, i32) {
    %c0_i32 = arith.constant 0 : i32
    %c0_i32_0 = arith.constant 0 : i32
    return %arg0, %c0_i32 : i32, i32
  }
  func.func @transform_1(%arg0: i32) -> (i32, i32) {
    %c0_i32 = arith.constant 0 : i32
    %c0_i32_0 = arith.constant 0 : i32
    %c0_i32_1 = arith.constant 0 : i32
    return %c0_i32, %c0_i32_0 : i32, i32
  }
  func.func @transform_2(%arg0: i32) -> (i32, i32) {
    %c0_i32 = arith.constant 0 : i32
    %c0_i32_0 = arith.constant 0 : i32
    %c0_i32_1 = arith.constant 0 : i32
    return %c0_i32, %c0_i32_0 : i32, i32
  }
  func.func @transform_3(%arg0: i32) -> (i32, i32) {
    %c0_i32 = arith.constant 0 : i32
    %c0_i32_0 = arith.constant 0 : i32
    %c0_i32_1 = arith.constant 0 : i32
    return %c0_i32, %c0_i32_0 : i32, i32
  }
  func.func @transform_4(%arg0: i32) -> (i32, i32) {
    %c0_i32 = arith.constant 0 : i32
    %c0_i32_0 = arith.constant 0 : i32
    %c0_i32_1 = arith.constant 0 : i32
    return %c0_i32, %c0_i32_0 : i32, i32
  }
  func.func @transform_5(%arg0: i32) -> (i32, i32) {
    %c0_i32 = arith.constant 0 : i32
    %c0_i32_0 = arith.constant 0 : i32
    %c0_i32_1 = arith.constant 0 : i32
    return %c0_i32, %c0_i32_0 : i32, i32
  }
  func.func @transform_6(%arg0: i32) -> (i32, i32) {
    %c0_i32 = arith.constant 0 : i32
    %c0_i32_0 = arith.constant 0 : i32
    %c0_i32_1 = arith.constant 0 : i32
    return %c0_i32, %c0_i32_0 : i32, i32
  }
  func.func @transform_7(%arg0: i32) -> (i32, i32) {
    %c0_i32 = arith.constant 0 : i32
    %c0_i32_0 = arith.constant 0 : i32
    %c0_i32_1 = arith.constant 0 : i32
    return %c0_i32, %c0_i32_0 : i32, i32
  }
  func.func @transform_8(%arg0: i32) -> (i32, i32) {
    %c0_i32 = arith.constant 0 : i32
    %c0_i32_0 = arith.constant 0 : i32
    %c0_i32_1 = arith.constant 0 : i32
    return %c0_i32, %c0_i32_0 : i32, i32
  }
  func.func @transform_9(%arg0: i32) -> (i32, i32) {
    %c0_i32 = arith.constant 0 : i32
    %c0_i32_0 = arith.constant 0 : i32
    %c0_i32_1 = arith.constant 0 : i32
    return %c0_i32, %c0_i32_0 : i32, i32
  }
  func.func @transform_10(%arg0: i32) -> (i32, i32) {
    %c0_i32 = arith.constant 0 : i32
    %c0_i32_0 = arith.constant 0 : i32
    %c0_i32_1 = arith.constant 0 : i32
    return %c0_i32, %c0_i32_0 : i32, i32
  }
  func.func @transform_11(%arg0: i32) -> (i32, i32) {
    %c0_i32 = arith.constant 0 : i32
    %c0_i32_0 = arith.constant 0 : i32
    %c0_i32_1 = arith.constant 0 : i32
    return %c0_i32, %c0_i32_0 : i32, i32
  }
  func.func @transform_12(%arg0: i32) -> (i32, i32) {
    %c0_i32 = arith.constant 0 : i32
    %c0_i32_0 = arith.constant 0 : i32
    %c0_i32_1 = arith.constant 0 : i32
    return %c0_i32, %c0_i32_0 : i32, i32
  }
  func.func @transform_13(%arg0: i32) -> (i32, i32) {
    %c0_i32 = arith.constant 0 : i32
    %c0_i32_0 = arith.constant 0 : i32
    %c0_i32_1 = arith.constant 0 : i32
    return %c0_i32, %c0_i32_0 : i32, i32
  }
  func.func @transform_14(%arg0: i32) -> (i32, i32) {
    %c0_i32 = arith.constant 0 : i32
    %c0_i32_0 = arith.constant 0 : i32
    %c0_i32_1 = arith.constant 0 : i32
    return %c0_i32, %c0_i32_0 : i32, i32
  }
  func.func @transform_15(%arg0: i32) -> (i32, i32) {
    %c0_i32 = arith.constant 0 : i32
    %c0_i32_0 = arith.constant 0 : i32
    %c0_i32_1 = arith.constant 0 : i32
    return %c0_i32, %c0_i32_0 : i32, i32
  }
  func.func @transform_16(%arg0: i32) -> (i32, i32) {
    %c0_i32 = arith.constant 0 : i32
    %c0_i32_0 = arith.constant 0 : i32
    %c0_i32_1 = arith.constant 0 : i32
    return %c0_i32, %c0_i32_0 : i32, i32
  }
  func.func @transform_17(%arg0: i32) -> (i32, i32) {
    %c0_i32 = arith.constant 0 : i32
    %c0_i32_0 = arith.constant 0 : i32
    %c0_i32_1 = arith.constant 0 : i32
    return %c0_i32, %c0_i32_0 : i32, i32
  }
  func.func @transform_18(%arg0: i32) -> (i32, i32) {
    %c0_i32 = arith.constant 0 : i32
    %c0_i32_0 = arith.constant 0 : i32
    %c0_i32_1 = arith.constant 0 : i32
    return %c0_i32, %c0_i32_0 : i32, i32
  }
  func.func @transform_19(%arg0: i32) -> (i32, i32) {
    %c0_i32 = arith.constant 0 : i32
    %c0_i32_0 = arith.constant 0 : i32
    %c0_i32_1 = arith.constant 0 : i32
    return %c0_i32, %c0_i32_0 : i32, i32
  }
  func.func @transform_20(%arg0: i32) -> (i32, i32) {
    %c0_i32 = arith.constant 0 : i32
    %c0_i32_0 = arith.constant 0 : i32
    %c0_i32_1 = arith.constant 0 : i32
    return %c0_i32, %c0_i32_0 : i32, i32
  }
  func.func @transform_21(%arg0: i32) -> (i32, i32) {
    %c0_i32 = arith.constant 0 : i32
    %c0_i32_0 = arith.constant 0 : i32
    return %arg0, %c0_i32 : i32, i32
  }
  func.func @transform_22(%arg0: i32) -> (i32, i32) {
    %c0_i32 = arith.constant 0 : i32
    %c0_i32_0 = arith.constant 0 : i32
    return %arg0, %c0_i32 : i32, i32
  }
}

</mosaic_0001>

<bundles_post_ra>
// kernel: tpu_custom_call.1
= control target key start
LH: loop header
LB: loop body
LE: loop exit
PB: predicated region body
PF: predicated region fallthrough
CT: control target
= control target key end

     0   :  { %s2392_s29 = smov 0   ;;  %s2860_s0 = inlined_call_operand.vmem [shape: f32[64,32], index: 0, kind: input, shape index: {}]   ;;  %s2861_s1 = inlined_call_operand.vmem [shape: f32[32,60], index: 1, kind: input, shape index: {}]   ;;  %s2862_s2 = inlined_call_operand.vmem [shape: f32[1,60], index: 2, kind: input, shape index: {}]   ;;  %s2863_s3 = inlined_call_operand.vmem [shape: f32[60,30], index: 3, kind: input, shape index: {}]   ;;  %s2864_s4 = inlined_call_operand.vmem [shape: f32[1,30], index: 4, kind: input, shape index: {}]   ;;  %s2865_s5 = inlined_call_operand.vmem [shape: f32[30,10], index: 5, kind: input, shape index: {}]   ;;  %s2866_s6 = inlined_call_operand.vmem [shape: f32[1,10], index: 6, kind: input, shape index: {}]   ;;  %s2867_s7 = inlined_call_operand.vmem [shape: f32[1,10], index: 7, kind: input, shape index: {}]   ;;  %s2868_s8 = inlined_call_operand.<no memory space> [shape: f32[1,1], index: 8, kind: input, shape index: {}]   ;;  %s2869_s9 = inlined_call_operand.vmem [shape: f32[1,10], index: 9, kind: input, shape index: {}]   ;;  %s2870_s10 = inlined_call_operand.vmem [shape: f32[1,10], index: 10, kind: input, shape index: {}]   ;;  %s2871_s11 = inlined_call_operand.vmem [shape: f32[10,30], index: 11, kind: input, shape index: {}]   ;;  %s2872_s12 = inlined_call_operand.vmem [shape: f32[1,30], index: 12, kind: input, shape index: {}]   ;;  %s2873_s13 = inlined_call_operand.vmem [shape: f32[30,60], index: 13, kind: input, shape index: {}]   ;;  %s2874_s14 = inlined_call_operand.vmem [shape: f32[1,60], index: 14, kind: input, shape index: {}]   ;;  %s2875_s15 = inlined_call_operand.vmem [shape: f32[60,32], index: 15, kind: input, shape index: {}]   ;;  %s2876_s16 = inlined_call_operand.vmem [shape: f32[1,32], index: 16, kind: input, shape index: {}]   ;;  %s2877_s17 = inlined_call_operand.vmem [shape: f32[4,10], index: 17, kind: input, shape index: {}]   ;;  %s2878_s18 = inlined_call_operand.vmem [shape: f32[1,10], index: 18, kind: input, shape index: {}]   ;;  %s2879_s19 = inlined_call_operand.vmem [shape: f32[2,10], index: 19, kind: input, shape index: {}]   ;;  %s2880_s20 = inlined_call_operand.vmem [shape: f32[1,2], index: 20, kind: input, shape index: {}]   ;;  %s2881_s21 = inlined_call_operand.vmem [shape: f32[64,32], index: 21, kind: output, shape index: {0}]   ;;  %s2882_s22 = inlined_call_operand.vmem [shape: f32[64,6], index: 22, kind: output, shape index: {1}]  }
   0x1   :  { %2886 = sst [smem:[#allocation3_spill]] %s2860_s0  ;;  %v28_v0 = vstv %s2868_s8 }
   0x2   :  { %2887 = sst [smem:[#allocation4_spill]] %s2861_s1  ;;  %29 = vst [vmem:[#allocation2] sm:$0x1] %v28_v0 }
   0x3   :  { %2888 = sst [smem:[#allocation5_spill]] %s2862_s2 }
   0x4   :  { %2889 = sst [smem:[#allocation6_spill]] %s2863_s3 }
   0x5   :  { %2890 = sst [smem:[#allocation7_spill]] %s2864_s4 }
   0x6   :  { %2891 = sst [smem:[#allocation8_spill]] %s2865_s5 }
   0x7   :  { %2892 = sst [smem:[#allocation9_spill]] %s2866_s6 }
   0x8 LB: > { %s1962_s30 = sadd.s32 4294967295, %s2270_s29   ;;  %p1966_p0 = scmp.ge.s32.totalorder %s2270_s29, 1  ;;  %s2270_s29 = sphi %s2392_s29, %s35_s29  }
   0x9   : > { %p618_p1 = scmp.lt.s32.totalorder %s2270_s29, 3 }
   0xb   : > { %p619_p2 = pnand %p1966_p0, %p618_p1 }
   0xc   : > { %s2893_s23 = sld [smem:[#allocation4_spill]] (!%p619_p2)  ;;  %s1967_s5 = sshll.u32 (!%p619_p2), %s1962_s30, 2 }
   0xd   : > { %622 = sbr.rel (%p619_p2) target bundleno = 2316 (0x90c), region = 104  ;;  %p686_p3 = scmp.lt.s32.totalorder (!%p619_p2), %s1967_s5, 7 }
   0xe   : > { %s2894_s28 = sld [smem:[#allocation3_spill]] (!%p619_p2) }
   0xf   : > { %s2895_s8 = sld [smem:[#allocation6_spill]] (!%p619_p2) }
  0x10   : > { %s2896_s25 = sld [smem:[#allocation5_spill]] (!%p619_p2) }
  0x11   : > { %s2897_s3 = sld [smem:[#allocation8_spill]] (!%p619_p2) }
  0x12   : > { %v710_v1 = vld [vmem:[%s2893_s23 + $0x18] sm:$0xff]  ;;  %v709_v2 = vld [vmem:[%s2893_s23 + $0x10] sm:$0xff]  ;;  %v708_v3 = vld [vmem:[%s2893_s23 + $0x8] sm:$0xff]  ;;  %s2901_s5 = smov (!%p686_p3, %s1967_s5), 7  ;;  %vm718_vm0 = vcmask 261120   ;;  %vm848_vm1 = vcmask 1043456  }
  0x13   : > { %2076 = vmatprep.subr.mxu1 %v710_v1  ;;  %v707_v4 = vld [vmem:[%s2893_s23] sm:$0xff]  ;;  %s2412_s2 = sshll.u32 %s2901_s5, 3  ;;  %vm835_vm2 = vcmask 490496   ;;  %vm965_vm3 = vcmask 1045504   ;;  %vm952_vm4 = vcmask 244736   ;;  %vm1069_vm5 = vcmask 80896  }
  0x14   : > { %2077 = vmatpush3.msra.mxu1 %v710_v1  ;;  %s689_s30 = scalar_lea.vmem %s2894_s28, %s2412_s2  ;;  %s2899_s28 = sld [smem:[#allocation9_spill]]  ;;  %v1990_v57 = vld [vmem:[%s2867_s7] ss:$0 sm:$0xff]  ;;  %vm1160_vm6 = vcmask 1041408   ;;  %vm1772_vm12 = vcmask 7168   ;;  %vm1788_vm13 = vcmask 15360  }
  0x15   : > { %2078 = vmatprep.subr.mxu1 %v709_v2  ;;  %v827_v5 = vld [vmem:[%s2895_s8 + $0x38] sm:$0xf]  ;;  %v2421_v6 = vld [vmem:[%s689_s30] sm:$0xff]  ;;  %v2423_v7 = vld [vmem:[%s689_s30 + $0x8] sm:$0xff]  ;;  %s695_s27 = scalar_lea.vmem %s2881_s21, %s2412_s2  ;;  %s2273_s5 = smov 4  }
  0x16   : > { %2079 = vmatpush3.msra.mxu1 %v709_v2  ;;  %v2425_v8 = vld [vmem:[%s689_s30 + $0x10] sm:$0xff]  ;;  %2084 = vmatprep.mubr.msk.f32.mxu1 %vm718_vm0, %v2421_v6  ;;  %v2437_v10 = vld [vmem:[%s689_s30 + $0x18] sm:$0xff]  ;;  %v825_v11 = vld [vmem:[%s2895_s8 + $0x28] sm:$0xff] }
  0x17   : > { %2080 = vmatprep.subr.mxu1 %v708_v3  ;;  %v826_v9 = vld [vmem:[%s2895_s8 + $0x30] sm:$0xff]  ;;  %v824_v12 = vld [vmem:[%s2895_s8 + $0x20] sm:$0xff]  ;;  %v823_v13 = vld [vmem:[%s2895_s8 + $0x18] sm:$0xff] }
  0x18   : > { %2081 = vmatpush3.msra.mxu1 %v708_v3  ;;  %v822_v14 = vld [vmem:[%s2895_s8 + $0x10] sm:$0xff]  ;;  %v821_v15 = vld [vmem:[%s2895_s8 + $0x8] sm:$0xff]  ;;  %v820_v16 = vld [vmem:[%s2895_s8] sm:$0xff] }
  0x19   : > { %2082 = vmatprep.subr.mxu1 %v707_v4  ;;  %v1973_v17 = vld [vmem:[%s2896_s25] ss:$0 sm:$0xff]  ;;  %v944_v30 = vld [vmem:[%s2897_s3 + $0x18] sm:$0x3f]  ;;  %v943_v31 = vld [vmem:[%s2897_s3 + $0x10] sm:$0xff]  ;;  %s2898_s25 = sld [smem:[#allocation7_spill]] }
  0x1a   : > { %2083 = vmatpush3.msra.mxu1 %v707_v4  ;;  %2112 = vmatprep.subr.msk.mxu0 %vm965_vm3, %v944_v30  ;;  %v942_v32 = vld [vmem:[%s2897_s3 + $0x8] sm:$0xff]  ;;  %v941_v33 = vld [vmem:[%s2897_s3] sm:$0xff] }
  0x1b   : > { %2085 = vmatmul.mubr.msk.f32.vlgmr.msra.gmra.mxu1 %vm718_vm0, %v2423_v7  ;;  %2090 = vmatprep.subr.msk.mxu1 %vm848_vm1, %v827_v5  ;;  %v1984_v47 = vld [vmem:[%s2899_s28] ss:$0 sm:$0xff] }
  0x1c   : > { %2087 = vmatprep.mubr.msk.f32.mxu1 %vm718_vm0, %v2425_v8  ;;  %2091 = vmatpush3.msk.msra.mxu1 %vm848_vm1, %v827_v5  ;;  %v2272_v5 = vmov 0  }
  0x1d   : > { %2092 = vmatprep.subr.mxu1 %v826_v9  ;;  %2113 = vmatpush3.msk.msra.mxu0 %vm965_vm3, %v944_v30 }
  0x1e   : > { %2093 = vmatpush3.msra.mxu1 %v826_v9  ;;  %2114 = vmatprep.subr.mxu0 %v943_v31  ;;  %v1991_v9 = vld [vmem:[#allocation2] ss:$0 sm:$0xff] }
  0x1f   : > { %2088 = vmatmul.mubr.msk.f32.gmra.mxu1 %vm718_vm0, %v2437_v10  ;;  %2094 = vmatprep.subr.mxu1 %v825_v11  ;;  %v1978_v34 = vld [vmem:[%s2898_s25] ss:$0 sm:$0xff]  ;;  %s701_s25 = scalar_lea.vmem %s2882_s22, %s2412_s2 }
  0x20   : > { %2095 = vmatpush3.msra.mxu1 %v825_v11  ;;  %2115 = vmatpush3.msra.mxu0 %v943_v31 }
  0x21   : > { %2096 = vmatprep.subr.mxu1 %v824_v12  ;;  %2116 = vmatprep.subr.mxu0 %v942_v32 }
  0x22   : > { %2097 = vmatpush3.msra.mxu1 %v824_v12  ;;  %2117 = vmatpush3.msra.mxu0 %v942_v32 }
  0x23   : > { %2098 = vmatprep.subr.mxu1 %v823_v13  ;;  %2118 = vmatprep.subr.mxu0 %v941_v33 }
  0x24   : > { %2099 = vmatpush3.msra.mxu1 %v823_v13  ;;  %2119 = vmatpush3.msra.mxu0 %v941_v33 }
  0x25   : > { %2100 = vmatprep.subr.mxu1 %v822_v14  ;;  %2182 = vset.pattern.permute.xlu0 %v2272_v5 }
  0x26   : > { %2101 = vmatpush3.msra.mxu1 %v822_v14  ;;  %2183 = vset.pattern.permute.xlu1 %v2272_v5 }
  0x27   : > { %2102 = vmatprep.subr.mxu1 %v821_v15 }
  0x28   : > { %2103 = vmatpush3.msra.mxu1 %v821_v15 }
  0x29   : > { %2104 = vmatprep.subr.mxu1 %v820_v16 }
  0x2a   : > { %2105 = vmatpush3.msra.mxu1 %v820_v16 }
  0xdb   : > { %v2086_v18 = vpop.f32.mrf.mxu1 }
  0xdc   : > { %v803_v19 = vadd.f32 %v2086_v18, %v1973_v17 }
  0xdd   : > { %v797_v20 = vpop.f32.mrf.mxu1 }
  0xde   : > { %v798_v21 = vadd.f32 %v1973_v17, %v797_v20  ;;  %v817_v25 = vmax.f32 %v803_v19, 0.0  ;;  %v1140_v19 = vld [vmem:[%s2871_s11 + $0x8] sm:$0x3]  ;;  %v1139_v20 = vld [vmem:[%s2871_s11] sm:$0xff] }
  0xdf   : > { %v2089_v22 = vpop.f32.mrf.mxu1  ;;  %2126 = vmatprep.subr.msk.mxu0 %vm1160_vm6, %v1140_v19 }
  0xe0   : > { %v816_v23 = vmax.f32 %v798_v21, 0.0  ;;  %v813_v24 = vadd.f32 %v2089_v22, %v1973_v17  ;;  %v1992_v21 = vld [vmem:[%s2869_s9] ss:$0 sm:$0xff] }
  0xe1   : > { %v807_v26 = vpop.f32.mrf.mxu1  ;;  %v1993_v22 = vld [vmem:[%s2870_s10] ss:$0 sm:$0xff] }
  0xe2   : > { %v808_v27 = vadd.f32 %v1973_v17, %v807_v26  ;;  %2106 = vmatprep.mubr.msk.f32.mxu1 %vm835_vm2, %v816_v23  ;;  %v819_v28 = vmax.f32 %v813_v24, 0.0 }
  0xe3   : > { %2107 = vmatmul.mubr.msk.f32.vlgmr.msra.gmra.mxu1 %vm835_vm2, %v817_v25 }
  0xe4   : > { %v818_v29 = vmax.f32 %v808_v27, 0.0 }
  0xe6   : > { %2109 = vmatprep.mubr.msk.f32.mxu1 %vm835_vm2, %v818_v29 }
  0xe7   : > { %2110 = vmatmul.mubr.msk.f32.gmra.mxu1 %vm835_vm2, %v819_v28 }
 0x1a3   : > { %v2108_v35 = vpop.f32.mrf.mxu1 }
 0x1a4   : > { %v924_v36 = vadd.f32 %v2108_v35, %v1978_v34 }
 0x1a5   : > { %v918_v37 = vpop.f32.mrf.mxu1 }
 0x1a6   : > { %v919_v38 = vadd.f32 %v1978_v34, %v918_v37  ;;  %v938_v41 = vmax.f32 %v924_v36, 0.0 }
 0x1a7   : > { %v2111_v39 = vpop.f32.mrf.mxu1 }
 0x1a8   : > { %v937_v40 = vmax.f32 %v919_v38, 0.0  ;;  %v934_v42 = vadd.f32 %v2111_v39, %v1978_v34  ;;  %v1256_v39 = vld [vmem:[%s2873_s13 + $0x18] sm:$0x3f] }
 0x1a9   : > { %v928_v43 = vpop.f32.mrf.mxu1  ;;  %2136 = vmatprep.subr.msk.mxu1 %vm965_vm3, %v1256_v39 }
 0x1aa   : > { %v929_v44 = vadd.f32 %v1978_v34, %v928_v43  ;;  %2120 = vmatprep.mubr.msk.f32.mxu0 %vm952_vm4, %v937_v40  ;;  %v940_v46 = vmax.f32 %v934_v42, 0.0  ;;  %2137 = vmatpush3.msk.msra.mxu1 %vm965_vm3, %v1256_v39  ;;  %v1255_v40 = vld [vmem:[%s2873_s13 + $0x10] sm:$0xff]  ;;  %v1253_v42 = vld [vmem:[%s2873_s13] sm:$0xff] }
 0x1ab   : > { %2121 = vmatmul.mubr.msk.f32.vlgmr.msra.gmra.mxu0 %vm952_vm4, %v938_v41  ;;  %v1254_v41 = vld [vmem:[%s2873_s13 + $0x8] sm:$0xff]  ;;  %2138 = vmatprep.subr.mxu1 %v1255_v40  ;;  %v1994_v43 = vld [vmem:[%s2872_s12] ss:$0 sm:$0xff] }
 0x1ac   : > { %v939_v45 = vmax.f32 %v929_v44, 0.0  ;;  %2127 = vmatpush3.msk.msra.mxu0 %vm1160_vm6, %v1140_v19  ;;  %2139 = vmatpush3.msra.mxu1 %v1255_v40  ;;  %v2000_v19 = vld [vmem:[%s2874_s14] ss:$0 sm:$0xff] }
 0x1ad   : > { %2128 = vmatprep.subr.mxu0 %v1139_v20  ;;  %2140 = vmatprep.subr.mxu1 %v1254_v41 }
 0x1ae   : > { %2123 = vmatprep.mubr.msk.f32.mxu0 %vm952_vm4, %v939_v45  ;;  %2129 = vmatpush3.msra.mxu0 %v1139_v20 }
 0x1af   : > { %2124 = vmatmul.mubr.msk.f32.gmra.mxu0 %vm952_vm4, %v940_v46  ;;  %2141 = vmatpush3.msra.mxu1 %v1254_v41 }
 0x1b0   : > { %2142 = vmatprep.subr.mxu1 %v1253_v42 }
 0x1b1   : > { %2143 = vmatpush3.msra.mxu1 %v1253_v42 }
 0x26b   : > { %v2122_v48 = vpop.f32.mrf.mxu0 }
 0x26c   : > { %v1041_v49 = vadd.f32 %v2122_v48, %v1984_v47 }
 0x26d   : > { %v1035_v50 = vpop.f32.mrf.mxu0 }
 0x26e   : > { %v1036_v51 = vadd.f32 %v1984_v47, %v1035_v50  ;;  %v1055_v53 = vmax.f32 %v1041_v49, 0.0 }
 0x26f   : > { %v2125_v52 = vpop.f32.mrf.mxu0 }
 0x270   : > { %v1054_v54 = vmax.f32 %v1036_v51, 0.0  ;;  %v1051_v55 = vadd.f32 %v2125_v52, %v1984_v47  ;;  %v1066_v63 = vmul.f32 %v1990_v57, %v1055_v53 }
 0x271   : > { %v1045_v56 = vpop.f32.mrf.mxu0 }
 0x272   : > { %v1046_v58 = vadd.f32 %v1984_v47, %v1045_v56  ;;  %v1065_v59 = vmul.f32 %v1990_v57, %v1054_v54  ;;  %v1057_v60 = vmax.f32 %v1051_v55, 0.0  ;;  %v1073_v2 = vsel %vm1069_vm5, %v1066_v63, 0.0  ;;  %v1375_v56 = vld [vmem:[%s2875_s15 + $0x38] sm:$0xf]  ;;  %v1368_v63 = vld [vmem:[%s2875_s15] sm:$0xff] }
 0x273   : > { %2150 = vmatprep.subr.msk.mxu0 %vm848_vm1, %v1375_v56 }
 0x274   : > { %v1056_v61 = vmax.f32 %v1046_v58, 0.0  ;;  %v1070_v62 = vsel %vm1069_vm5, %v1065_v59, 0.0  ;;  %v1068_v3 = vmul.f32 %v1990_v57, %v1057_v60  ;;  %v1373_v58 = vld [vmem:[%s2875_s15 + $0x28] sm:$0xff]  ;;  %v1372_v59 = vld [vmem:[%s2875_s15 + $0x20] sm:$0xff]  ;;  %v1371_v60 = vld [vmem:[%s2875_s15 + $0x18] sm:$0xff] }
 0x275   : > { %1071 = vadd.xlane.f32.xlu0 %v1070_v62  ;;  %v1369_v62 = vld [vmem:[%s2875_s15 + $0x8] sm:$0xff] }
 0x276   : > { %v1067_v0 = vmul.f32 %v1990_v57, %v1056_v61  ;;  %v1079_v4 = vsel %vm1069_vm5, %v1068_v3, 0.0  ;;  %v1374_v57 = vld [vmem:[%s2875_s15 + $0x30] sm:$0xff]  ;;  %v1502_v3 = vmul.f32 %v2437_v10, %v2437_v10 }
 0x277   : > { %v1370_v61 = vld [vmem:[%s2875_s15 + $0x10] sm:$0xff] }
 0x278   : > { %v1076_v1 = vsel %vm1069_vm5, %v1067_v0, 0.0  ;;  %v1499_v0 = vmul.f32 %v2421_v6, %v2421_v6  ;;  %v1512_v5 = vsel %vm718_vm0, %v1502_v3, 0.0 }
 0x279   : > { %1077 = vadd.xlane.f32.xlu1 %v1076_v1  ;;  %1074 = vadd.xlane.f32.xlu0 %v1073_v2  ;;  %v1500_v1 = vmul.f32 %v2423_v7, %v2423_v7  ;;  %v1487_v2 = vsel %vm718_vm0, %v2421_v6, 0.0 }
 0x27d   : > { %1080 = vadd.xlane.f32.xlu1 %v1079_v4  ;;  %v1503_v4 = vsel %vm718_vm0, %v1499_v0, 0.0 }
 0x2fe   : > { %v1072_v11 = vpop.xlane.xlu0 %1071 }
 0x2ff   : > { %v2498_v12 = vadd.f32 %v1991_v9, %v1072_v11  ;;  %v1501_v11 = vmul.f32 %v2425_v8, %v2425_v8 }
 0x301   : > { %1096 = vperm.xlu0 %2182, %v2498_v12  }
 0x302   : > { %v1078_v13 = vpop.xlane.xlu1 %1077  ;;  %v1075_v14 = vpop.xlane.xlu0 %1074 }
 0x303   : > { %v2501_v15 = vadd.f32 %v1991_v9, %v1075_v14  ;;  %v2504_v16 = vadd.f32 %v1991_v9, %v1078_v13  ;;  %v1493_v13 = vsel %vm718_vm0, %v2425_v8, 0.0  ;;  %v1509_v14 = vsel %vm718_vm0, %v1501_v11, 0.0 }
 0x305   : > { %1101 = vperm.xlu1 %2183, %v2501_v15  }
 0x306   : > { %v1081_v17 = vpop.xlane.xlu1 %1080 }
 0x307   : > { %v2507_v18 = vadd.f32 %v1991_v9, %v1081_v17  ;;  %v1506_v9 = vsel %vm718_vm0, %v1500_v1, 0.0  ;;  %v1490_v17 = vsel %vm718_vm0, %v2423_v7, 0.0 }
 0x309   : > { %1106 = vperm.xlu1 %2183, %v2504_v16  }
 0x30d   : > { %1111 = vperm.xlu1 %2183, %v2507_v18  }
 0x320   : > { %1488 = vadd.xlane.f32.xlu0 %v1487_v2 }
 0x324   : > { %1513 = vadd.xlane.f32.xlu0 %v1512_v5 }
 0x328   : > { %1494 = vadd.xlane.f32.xlu0 %v1493_v13 }
 0x331   : > { %1504 = vadd.xlane.f32.xlu1 %v1503_v4 }
 0x335   : > { %1507 = vadd.xlane.f32.xlu1 %v1506_v9 }
 0x339   : > { %1510 = vadd.xlane.f32.xlu1 %v1509_v14 }
 0x33d   : > { %1491 = vadd.xlane.f32.xlu1 %v1490_v17 }
 0x37c   : > { %v2522_v23 = vpop.permute.xlu0 %1096 }
 0x37d   : > { %v1120_v24 = vmul.f32 %v1992_v21, %v2522_v23 }
 0x37f   : > { %v1131_v25 = vadd.f32 %v1993_v22, %v1120_v24 }
 0x380   : > { %v2525_v26 = vpop.permute.xlu1 %1101 }
 0x381   : > { %2184 = vtanh.f32 %v1131_v25  ;;  %v1121_v27 = vmul.f32 %v1992_v21, %v2525_v26 }
 0x383   : > { %v1132_v28 = vadd.f32 %v1993_v22, %v1121_v27 }
 0x384   : > { %v2528_v29 = vpop.permute.xlu1 %1106 }
 0x385   : > { %2186 = vtanh.f32 %v1132_v28  ;;  %v1122_v30 = vmul.f32 %v1992_v21, %v2528_v29 }
 0x387   : > { %v1133_v31 = vadd.f32 %v1993_v22, %v1122_v30 }
 0x388   : > { %v2531_v32 = vpop.permute.xlu1 %1111 }
 0x389   : > { %2188 = vtanh.f32 %v1133_v31  ;;  %v1123_v33 = vmul.f32 %v1992_v21, %v2531_v32 }
 0x38b   : > { %v1134_v34 = vadd.f32 %v1993_v22, %v1123_v33 }
 0x38d   : > { %2190 = vtanh.f32 %v1134_v34 }
 0x38e   : > { %v2185_v35 = vpop.eup %2184 }
 0x38f   : > { %2130 = vmatprep.mubr.msk.f32.mxu0 %vm1069_vm5, %v2185_v35 }
 0x392   : > { %v2187_v36 = vpop.eup %2186 }
 0x393   : > { %2131 = vmatmul.mubr.msk.f32.vlgmr.msra.gmra.mxu0 %vm1069_vm5, %v2187_v36  ;;  %v2006_v36 = vld [vmem:[%s2876_s16] ss:$0 sm:$0xff] }
 0x394   : > { %2151 = vmatpush3.msk.msra.mxu0 %vm848_vm1, %v1375_v56 }
 0x395   : > { %2152 = vmatprep.subr.mxu0 %v1374_v57 }
 0x396   : > { %v2189_v37 = vpop.eup %2188  ;;  %2153 = vmatpush3.msra.mxu0 %v1374_v57 }
 0x397   : > { %2133 = vmatprep.mubr.msk.f32.mxu0 %vm1069_vm5, %v2189_v37  ;;  %2154 = vmatprep.subr.mxu0 %v1373_v58 }
 0x398   : > { %2155 = vmatpush3.msra.mxu0 %v1373_v58 }
 0x399   : > { %2156 = vmatprep.subr.mxu0 %v1372_v59 }
 0x39a   : > { %v2191_v38 = vpop.eup %2190  ;;  %2157 = vmatpush3.msra.mxu0 %v1372_v59 }
 0x39b   : > { %2134 = vmatmul.mubr.msk.f32.gmra.mxu0 %vm1069_vm5, %v2191_v38  ;;  %2158 = vmatprep.subr.mxu0 %v1371_v60 }
 0x39c   : > { %2159 = vmatpush3.msra.mxu0 %v1371_v60 }
 0x39d   : > { %2160 = vmatprep.subr.mxu0 %v1370_v61 }
 0x39e   : > { %2161 = vmatpush3.msra.mxu0 %v1370_v61 }
 0x39f   : > { %2162 = vmatprep.subr.mxu0 %v1369_v62 }
 0x3a0   : > { %2163 = vmatpush3.msra.mxu0 %v1369_v62 }
 0x3a1   : > { %2164 = vmatprep.subr.mxu0 %v1368_v63 }
 0x3a2   : > { %2165 = vmatpush3.msra.mxu0 %v1368_v63 }
 0x3a9   : > { %v1489_v62 = vpop.xlane.xlu0 %1488 }
 0x3aa   : > { %v1619_v0 = vmul.f32 %v1489_v62, %v1489_v62 }
 0x3ac   : > { %v1623_v3 = vmul.f32 0.03125, %v1619_v0 }
 0x3ad   : > { %v2637_v2 = vpop.xlane.xlu0 %1513 }
 0x3b1   : > { %v1495_v11 = vpop.xlane.xlu0 %1494 }
 0x3b2   : > { %v1621_v14 = vmul.f32 %v1495_v11, %v1495_v11 }
 0x3ba   : > { %v1505_v59 = vpop.xlane.xlu1 %1504 }
 0x3bb   : > { %v1627_v5 = vsub.f32 %v1505_v59, %v1623_v3 }
 0x3bd   : > { %v1631_v13 = vmax.f32 %v1627_v5, 0.0 }
 0x3be   : > { %v1508_v60 = vpop.xlane.xlu1 %1507 }
 0x3c2   : > { %v2635_v61 = vpop.xlane.xlu1 %1510 }
 0x453   : > { %v2132_v44 = vpop.f32.mrf.mxu0 }
 0x454   : > { %v1236_v45 = vadd.f32 %v2132_v44, %v1994_v43 }
 0x455   : > { %v1230_v46 = vpop.f32.mrf.mxu0 }
 0x456   : > { %v1231_v47 = vadd.f32 %v1994_v43, %v1230_v46 }
 0x458   : > { %2192 = vtanh.f32 %v1231_v47 }
 0x459   : > { %2194 = vtanh.f32 %v1236_v45 }
 0x45b   : > { %v2135_v48 = vpop.f32.mrf.mxu0 }
 0x45c   : > { %v1246_v49 = vadd.f32 %v2135_v48, %v1994_v43 }
 0x45d   : > { %v1240_v50 = vpop.f32.mrf.mxu0 }
 0x45e   : > { %v1241_v51 = vadd.f32 %v1994_v43, %v1240_v50 }
 0x460   : > { %2196 = vtanh.f32 %v1241_v51 }
 0x461   : > { %2198 = vtanh.f32 %v1246_v49 }
 0x465   : > { %v2193_v52 = vpop.eup %2192 }
 0x466   : > { %v2195_v53 = vpop.eup %2194  ;;  %2144 = vmatprep.mubr.msk.f32.mxu1 %vm952_vm4, %v2193_v52  ;;  %v1496_v52 = vsel %vm718_vm0, %v2437_v10, 0.0 }
 0x467   : > { %2145 = vmatmul.mubr.msk.f32.vlgmr.msra.gmra.mxu1 %vm952_vm4, %v2195_v53 }
 0x46d   : > { %v2197_v54 = vpop.eup %2196 }
 0x46e   : > { %v2199_v55 = vpop.eup %2198  ;;  %2147 = vmatprep.mubr.msk.f32.mxu1 %vm952_vm4, %v2197_v54 }
 0x46f   : > { %2148 = vmatmul.mubr.msk.f32.gmra.mxu1 %vm952_vm4, %v2199_v55 }
 0x527   : > { %v2146_v20 = vpop.f32.mrf.mxu1 }
 0x528   : > { %v1351_v21 = vadd.f32 %v2146_v20, %v2000_v19 }
 0x529   : > { %v1345_v22 = vpop.f32.mrf.mxu1 }
 0x52a   : > { %v1346_v24 = vadd.f32 %v2000_v19, %v1345_v22  ;;  %v2644_v22 = vmul.f32 0.032258064, %v1631_v13 }
 0x52c   : > { %2200 = vtanh.f32 %v1346_v24  ;;  %v1625_v24 = vmul.f32 0.03125, %v1621_v14  ;;  %vm1641_vm8 = vcmp.eq.f32.partialorder %v2644_v22, inf }
 0x52d   : > { %2202 = vtanh.f32 %v1351_v21 }
 0x52f   : > { %v2149_v25 = vpop.f32.mrf.mxu1 }
 0x530   : > { %v1361_v27 = vadd.f32 %v2149_v25, %v2000_v19 }
 0x531   : > { %v1355_v28 = vpop.f32.mrf.mxu1 }
 0x532   : > { %v1356_v30 = vadd.f32 %v2000_v19, %v1355_v28 }
 0x534   : > { %2204 = vtanh.f32 %v1356_v30 }
 0x535   : > { %2206 = vtanh.f32 %v1361_v27 }
 0x539   : > { %v2201_v31 = vpop.eup %2200 }
 0x53a   : > { %v2203_v33 = vpop.eup %2202  ;;  %2166 = vmatprep.mubr.msk.f32.mxu0 %vm835_vm2, %v2201_v31 }
 0x53b   : > { %2167 = vmatmul.mubr.msk.f32.vlgmr.msra.gmra.mxu0 %vm835_vm2, %v2203_v33 }
 0x541   : > { %v2205_v34 = vpop.eup %2204 }
 0x542   : > { %v2207_v35 = vpop.eup %2206  ;;  %2169 = vmatprep.mubr.msk.f32.mxu0 %vm835_vm2, %v2205_v34  ;;  %v1629_v34 = vsub.f32 %v2635_v61, %v1625_v24 }
 0x543   : > { %2170 = vmatmul.mubr.msk.f32.gmra.mxu0 %vm835_vm2, %v2207_v35 }
 0x5fb   : > { %v2168_v37 = vpop.f32.mrf.mxu0 }
 0x5fc   : > { %v1470_v38 = vadd.f32 %v2168_v37, %v2006_v36 }
 0x5fd   : > { %v1464_v39 = vpop.f32.mrf.mxu0 }
 0x5fe   : > { %v1465_v40 = vadd.f32 %v2006_v36, %v1464_v39  ;;  %v1532_v41 = vmul.f32 %v1470_v38, %v1470_v38  ;;  %v1516_v42 = vmul.f32 %v1470_v38, %v2423_v7  ;;  %1484 = vst.msk [vmem:[%s695_s27 + $0x8] sm:$0xff] %vm718_vm0, %v1470_v38 }
 0x600   : > { %1483 = vst.msk [vmem:[%s695_s27] sm:$0xff] %vm718_vm0, %v1465_v40  ;;  %v1538_v43 = vsel %vm718_vm0, %v1532_v41, 0.0  ;;  %v1522_v44 = vsel %vm718_vm0, %v1516_v42, 0.0  ;;  %v1531_v45 = vmul.f32 %v1465_v40, %v1465_v40  ;;  %v1515_v46 = vmul.f32 %v1465_v40, %v2421_v6 }
 0x601   : > { %1539 = vadd.xlane.f32.xlu1 %v1538_v43  ;;  %1523 = vadd.xlane.f32.xlu0 %v1522_v44  ;;  %v1608_v41 = vmax.f32 %v1508_v60, 1e-20  ;;  %v1633_v42 = vmax.f32 %v1629_v34, 0.0  ;;  %v1644_v34 = vand.u32 2147483648, %v2644_v22 }
 0x602   : > { %v1535_v49 = vsel %vm718_vm0, %v1531_v45, 0.0  ;;  %v1519_v50 = vsel %vm718_vm0, %v1515_v46, 0.0 }
 0x603   : > { %v2171_v47 = vpop.f32.mrf.mxu0 }
 0x604   : > { %v1480_v48 = vadd.f32 %v2171_v47, %v2006_v36 }
 0x605   : > { %v1474_v7 = vpop.f32.mrf.mxu0  ;;  %1536 = vadd.xlane.f32.xlu0 %v1535_v49  ;;  %1520 = vadd.xlane.f32.xlu1 %v1519_v50  ;;  %v1607_v49 = vmax.f32 %v1505_v59, 1e-20 }
 0x606   : > { %v1475_v51 = vadd.f32 %v2006_v36, %v1474_v7  ;;  %v1518_v53 = vmul.f32 %v1480_v48, %v2437_v10  ;;  %1486 = vst.msk [vmem:[%s695_s27 + $0x18] sm:$0xff] %vm718_vm0, %v1480_v48  ;;  %v1534_v58 = vmul.f32 %v1480_v48, %v1480_v48  ;;  %v2662_v7 = vmul.f32 0.032258064, %v1633_v42 }
 0x608   : > { %1485 = vst.msk [vmem:[%s695_s27 + $0x10] sm:$0xff] %vm718_vm0, %v1475_v51  ;;  %v1528_v6 = vsel %vm718_vm0, %v1518_v53, 0.0  ;;  %v1517_v54 = vmul.f32 %v1475_v51, %v2425_v8  ;;  %v1533_v56 = vmul.f32 %v1475_v51, %v1475_v51  ;;  %v1544_v10 = vsel %vm718_vm0, %v1534_v58, 0.0  ;;  %v1492_v8 = vpop.xlane.xlu1 %1491 }
 0x609   : > { %1497 = vadd.xlane.f32.xlu0 %v1496_v52  ;;  %1529 = vadd.xlane.f32.xlu1 %v1528_v6  ;;  %v1620_v63 = vmul.f32 %v1492_v8, %v1492_v8  ;;  %vm1655_vm1 = vcmp.eq.f32.partialorder %v2662_v7, inf  ;;  %vm1657_vm3 = vcmp.eq.f32.partialorder %v2662_v7, 0.0 }
 0x60a   : > { %v1525_v55 = vsel %vm718_vm0, %v1517_v54, 0.0  ;;  %v1541_v57 = vsel %vm718_vm0, %v1533_v56, 0.0  ;;  %v1609_v54 = vmax.f32 %v2635_v61, 1e-20  ;;  %vm1643_vm0 = vcmp.eq.f32.partialorder %v2644_v22, 0.0 }
 0x60b   : > { %v1624_v1 = vmul.f32 0.03125, %v1620_v63  ;;  %v1610_v63 = vmax.f32 %v2637_v2, 1e-20 }
 0x60d   : > { %1526 = vadd.xlane.f32.xlu1 %v1525_v55  ;;  %v1628_v4 = vsub.f32 %v1508_v60, %v1624_v1 }
 0x60f   : > { %v1632_v9 = vmax.f32 %v1628_v4, 0.0 }
 0x611   : > { %1542 = vadd.xlane.f32.xlu1 %v1541_v57  ;;  %v2639_v17 = vmul.f32 0.032258064, %v1632_v9 }
 0x613   : > { %2208 = vrsqrt.f32 %v2639_v17  ;;  %vm1648_vm7 = vcmp.eq.f32.partialorder %v2639_v17, inf  ;;  %v1651_v4 = vand.u32 2147483648, %v2639_v17  ;;  %vm1650_vm9 = vcmp.eq.f32.partialorder %v2639_v17, 0.0 }
 0x614   : > { %2210 = vrsqrt.f32 %v2644_v22 }
 0x615   : > { %1545 = vadd.xlane.f32.xlu1 %v1544_v10 }
 0x620   : > { %v2209_v53 = vpop.eup %2208 }
 0x621   : > { %v2211_v10 = vpop.eup %2210 }
 0x622   : > { %v1640_v3 = vmul.f32 %v2211_v10, %v2644_v22 }
 0x68a   : > { %v1540_v19 = vpop.xlane.xlu1 %1539  ;;  %v2641_v20 = vpop.xlane.xlu0 %1523 }
 0x68b   : > { %v1564_v21 = vmul.f32 2.0, %v2641_v20  ;;  %v1548_v25 = vmul.f32 %v1540_v19, %v1508_v60 }
 0x68d   : > { %v1568_v27 = vsub.f32 %v1508_v60, %v1564_v21  ;;  %v1552_v35 = vmax.f32 %v1548_v25, 1e-16  ;;  %v1647_v60 = vmul.f32 %v2209_v53, %v2639_v17 }
 0x68e   : > { %v2647_v28 = vpop.xlane.xlu1 %1520  ;;  %v1537_v30 = vpop.xlane.xlu0 %1536 }
 0x68f   : > { %v1572_v31 = vadd.f32 %v1568_v27, %v1540_v19  ;;  %v1563_v33 = vmul.f32 2.0, %v2647_v28  ;;  %v1547_v38 = vmul.f32 %v1537_v30, %v1505_v59  ;;  %v2701_v27 = vld [vmem:[%s2877_s17 + $0x1] ss:$0 sm:$0xff] }
 0x691   : > { %v2652_v36 = vmax.f32 %v1572_v31, 0.0  ;;  %v1567_v37 = vsub.f32 %v1505_v59, %v1563_v33  ;;  %v1551_v45 = vmax.f32 %v1547_v38, 1e-16  ;;  %v2674_v59 = vld [vmem:[%s2877_s17] ss:$0 sm:$0xff] }
 0x692   : > { %v2654_v39 = vpop.xlane.xlu1 %1529  ;;  %v1498_v40 = vpop.xlane.xlu0 %1497  ;;  %v1673_v62 = vmul.f32 %v2674_v59, %v2525_v26  ;;  %v1649_v26 = vsel %vm1648_vm7, %v2639_v17, %v1647_v60 }
 0x693   : > { %2212 = vrsqrt.f32 %v2652_v36  ;;  %v1571_v43 = vadd.f32 %v1567_v37, %v1537_v30  ;;  %v1622_v44 = vmul.f32 %v1498_v40, %v1498_v40  ;;  %v1566_v57 = vmul.f32 2.0, %v2654_v39  ;;  %v2718_v40 = vld [vmem:[%s2877_s17 + $0x2] ss:$0 sm:$0xff] }
 0x694   : > { %2214 = vrsqrt.f32 %v1552_v35  ;;  %vm1588_vm10 = vcmp.eq.f32.partialorder %v2652_v36, inf  ;;  %v1591_v19 = vand.u32 2147483648, %v2652_v36  ;;  %vm1590_vm11 = vcmp.eq.f32.partialorder %v2652_v36, 0.0 }
 0x695   : > { %v2657_v46 = vmax.f32 %v1571_v43, 0.0  ;;  %v1626_v47 = vmul.f32 0.03125, %v1622_v44  ;;  %2216 = vrsqrt.f32 %v1608_v41  ;;  %v1570_v9 = vsub.f32 %v2637_v2, %v1566_v57 }
 0x696   : > { %v2659_v48 = vpop.xlane.xlu1 %1526  ;;  %v1642_v37 = vsel %vm1641_vm8, %v2644_v22, %v1640_v3  ;;  %v2713_v38 = vsel %vm1650_vm9, %v1651_v4, %v1649_v26 }
 0x697   : > { %v1565_v50 = vmul.f32 2.0, %v2659_v48  ;;  %2218 = vrsqrt.f32 %v2657_v46  ;;  %v1630_v51 = vsub.f32 %v2637_v2, %v1626_v47  ;;  %vm1581_vm14 = vcmp.eq.f32.partialorder %v2657_v46, inf }
 0x698   : > { %2220 = vrsqrt.f32 %v1551_v45  ;;  %v1584_v43 = vand.u32 2147483648, %v2657_v46  ;;  %vm1583_vm15 = vcmp.eq.f32.partialorder %v2657_v46, 0.0  ;;  %v2745_v57 = vsel %vm1643_vm0, %v1644_v34, %v1642_v37 }
 0x699   : > { %v1569_v52 = vsub.f32 %v2635_v61, %v1565_v50  ;;  %2222 = vrsqrt.f32 %v1607_v49  ;;  %v1634_v58 = vmax.f32 %v1630_v51, 0.0 }
 0x69a   : > { %v1543_v6 = vpop.xlane.xlu1 %1542  ;;  %2224 = vrsqrt.f32 %v2662_v7 }
 0x69b   : > { %v1549_v55 = vmul.f32 %v1543_v6, %v2635_v61  ;;  %v1573_v56 = vadd.f32 %v1569_v52, %v1543_v6  ;;  %2226 = vrsqrt.f32 %v1609_v54  ;;  %v2686_v5 = vmul.f32 0.032258064, %v1634_v58  ;;  %v2750_v58 = vld [vmem:[%s2878_s18] ss:$0 sm:$0xff] }
 0x69c   : > { %v1672_v6 = vmul.f32 %v2674_v59, %v2522_v23 }
 0x69d   : > { %v2677_v8 = vmax.f32 %v1573_v56, 0.0  ;;  %v1553_v0 = vmax.f32 %v1549_v55, 1e-16  ;;  %vm1662_vm8 = vcmp.eq.f32.partialorder %v2686_v5, inf  ;;  %vm1664_vm9 = vcmp.eq.f32.partialorder %v2686_v5, 0.0 }
 0x69e   : > { %v1546_v61 = vpop.xlane.xlu1 %1545 }
 0x69f   : > { %2228 = vrsqrt.f32 %v2677_v8  ;;  %v1550_v13 = vmul.f32 %v1546_v61, %v2637_v2  ;;  %v1574_v21 = vadd.f32 %v1570_v9, %v1546_v61  ;;  %vm1595_vm2 = vcmp.eq.f32.partialorder %v2677_v8, inf }
 0x6a0   : > { %v2213_v1 = vpop.eup %2212  ;;  %2230 = vrsqrt.f32 %v1553_v0  ;;  %v1658_v0 = vand.u32 2147483648, %v2662_v7  ;;  %vm1597_vm4 = vcmp.eq.f32.partialorder %v2677_v8, 0.0 }
 0x6a1   : > { %v1587_v11 = vmul.f32 %v2213_v1, %v2652_v36  ;;  %v2215_v14 = vpop.eup %2214  ;;  %2232 = vrsqrt.f32 %v2686_v5  ;;  %v1554_v30 = vmax.f32 %v1550_v13, 1e-16  ;;  %v2704_v31 = vmax.f32 %v1574_v21, 0.0 }
 0x6a2   : > { %v2217_v25 = vpop.eup %2216  ;;  %v1560_v35 = vmul.f32 %v2215_v14, %v2641_v20 }
 0x6a3   : > { %v1589_v24 = vsel %vm1588_vm10, %v2652_v36, %v1587_v11  ;;  %2234 = vrsqrt.f32 %v2704_v31  ;;  %v1598_v11 = vand.u32 2147483648, %v2677_v8  ;;  %vm1602_vm6 = vcmp.eq.f32.partialorder %v2704_v31, inf }
 0x6a4   : > { %v1592_v2 = vsel %vm1590_vm11, %v1591_v19, %v1589_v24  ;;  %v2219_v33 = vpop.eup %2218  ;;  %2236 = vrsqrt.f32 %v1554_v30  ;;  %v1695_v51 = vmul.f32 %v2718_v40, %v1560_v35  ;;  %v1605_v37 = vand.u32 2147483648, %v2704_v31 }
 0x6a5   : > { %v1616_v36 = vmul.f32 %v2217_v25, %v1592_v2  ;;  %v1580_v41 = vmul.f32 %v2219_v33, %v2657_v46  ;;  %v2221_v20 = vpop.eup %2220  ;;  %2238 = vrsqrt.f32 %v1610_v63  ;;  %v1674_v25 = vmul.f32 %v2674_v59, %v2528_v29 }
 0x6a6   : > { %v2223_v44 = vpop.eup %2222  ;;  %v1559_v53 = vmul.f32 %v2221_v20, %v2647_v28  ;;  %vm1604_vm7 = vcmp.eq.f32.partialorder %v2704_v31, 0.0  ;;  %vm1857_vm10 = vcmask 23552   ;;  %vm1867_vm11 = vcmask 48128  }
 0x6a7   : > { %v1682_v42 = vmul.f32 %v2701_v27, %v1616_v36  ;;  %v1850_v17 = vsel %vm1772_vm12, %v2501_v15, %v1616_v36  ;;  %v1582_v45 = vsel %vm1581_vm14, %v2657_v46, %v1580_v41  ;;  %v2225_v49 = vpop.eup %2224  ;;  %v2737_v15 = vld [vmem:[%s2877_s17 + $0x3] ss:$0 sm:$0xff] }
 0x6a8   : > { %v2730_v47 = vsel %vm1788_vm13, %v1850_v17, %v1560_v35  ;;  %v1585_v52 = vsel %vm1583_vm15, %v1584_v43, %v1582_v45  ;;  %v1708_v54 = vmul.f32 %v2737_v15, %v2713_v38  ;;  %v2227_v55 = vpop.eup %2226  ;;  %v1654_v56 = vmul.f32 %v2225_v49, %v2662_v7 }
 0x6a9   : > { %v1686_v50 = vadd.f32 %v1682_v42, %v1673_v62  ;;  %v1615_v46 = vmul.f32 %v2223_v44, %v1585_v52  ;;  %v1694_v63 = vmul.f32 %v2718_v40, %v1559_v53  ;;  %v1707_v1 = vmul.f32 %v2737_v15, %v2745_v57 }
 0x6aa   : > { %v1656_v9 = vsel %vm1655_vm1, %v2662_v7, %v1654_v56 }
 0x6ab   : > { %v1699_v22 = vadd.f32 %v1695_v51, %v1686_v50  ;;  %v1681_v28 = vmul.f32 %v2701_v27, %v1615_v46  ;;  %v1849_v10 = vsel %vm1772_vm12, %v2498_v12, %v1615_v46  ;;  %v2774_v33 = vsel %vm1657_vm3, %v1658_v0, %v1656_v9 }
 0x6ac   : > { %v2757_v60 = vsel %vm1788_vm13, %v1849_v10, %v1559_v53  ;;  %v2229_v62 = vpop.eup %2228  ;;  %v1709_v49 = vmul.f32 %v2737_v15, %v2774_v33  ;;  %v1675_v51 = vmul.f32 %v2674_v59, %v2531_v32  ;;  %v2017_v32 = vld [vmem:[%s2879_s19] ss:$0 sm:$0xff] }
 0x6ad   : > { %v1712_v23 = vadd.f32 %v1708_v54, %v1699_v22  ;;  %v1685_v61 = vadd.f32 %v1681_v28, %v1672_v6  ;;  %v1594_v4 = vmul.f32 %v2229_v62, %v2677_v8  ;;  %v2231_v12 = vpop.eup %2230 }
 0x6ae   : > { %v2233_v13 = vpop.eup %2232  ;;  %v1561_v2 = vmul.f32 %v2231_v12, %v2659_v48 }
 0x6af   : > { %v1723_v3 = vadd.f32 %v2750_v58, %v1712_v23  ;;  %v1698_v26 = vadd.f32 %v1694_v63, %v1685_v61  ;;  %v1596_v14 = vsel %vm1595_vm2, %v2677_v8, %v1594_v4  ;;  %v1661_v34 = vmul.f32 %v2233_v13, %v2686_v5 }
 0x6b0   : > { %v1599_v19 = vsel %vm1597_vm4, %v1598_v11, %v1596_v14  ;;  %v2235_v24 = vpop.eup %2234  ;;  %v1696_v43 = vmul.f32 %v2718_v40, %v1561_v2 }
 0x6b1   : > { %2240 = vtanh.f32 %v1723_v3  ;;  %v1711_v21 = vadd.f32 %v1707_v1, %v1698_v26  ;;  %v1617_v30 = vmul.f32 %v2227_v55, %v1599_v19  ;;  %v1601_v7 = vmul.f32 %v2235_v24, %v2704_v31  ;;  %v2237_v36 = vpop.eup %2236  ;;  %v2018_v55 = vld [vmem:[%s2879_s19 + $0x1] ss:$0 sm:$0xff]  ;;  %v2019_v24 = vld [vmem:[%s2880_s20] ss:$0 sm:$0xff] }
 0x6b2   : > { %v2239_v20 = vpop.eup %2238  ;;  %v1663_v44 = vsel %vm1662_vm8, %v2686_v5, %v1661_v34  ;;  %v1562_v45 = vmul.f32 %v2237_v36, %v2654_v39 }
 0x6b3   : > { %v1722_v35 = vadd.f32 %v2750_v58, %v1711_v21  ;;  %v1683_v8 = vmul.f32 %v2701_v27, %v1617_v30  ;;  %v1851_v29 = vsel %vm1772_vm12, %v2504_v16, %v1617_v30  ;;  %v1603_v48 = vsel %vm1602_vm6, %v2704_v31, %v1601_v7 }
 0x6b4   : > { %v2787_v41 = vsel %vm1788_vm13, %v1851_v29, %v1561_v2  ;;  %v1606_v17 = vsel %vm1604_vm7, %v1605_v37, %v1603_v48  ;;  %v1665_v31 = vand.u32 2147483648, %v2686_v5  ;;  %v1697_v22 = vmul.f32 %v2718_v40, %v1562_v45 }
 0x6b5   : > { %2242 = vtanh.f32 %v1722_v35  ;;  %v1687_v42 = vadd.f32 %v1683_v8, %v1674_v25  ;;  %v1618_v16 = vmul.f32 %v2239_v20, %v1606_v17 }
 0x6b6   : > { %v1666_v6 = vsel %vm1664_vm9, %v1665_v31, %v1663_v44 }
 0x6b7   : > { %v1700_v50 = vadd.f32 %v1696_v43, %v1687_v42  ;;  %v1684_v52 = vmul.f32 %v2701_v27, %v1618_v16  ;;  %v1852_v53 = vsel %vm1772_vm12, %v2507_v18, %v1618_v16  ;;  %v1710_v56 = vmul.f32 %v2737_v15, %v1666_v6 }
 0x6b8   : > { %v1856_v39 = vsel %vm1788_vm13, %v1852_v53, %v1562_v45 }
 0x6b9   : > { %v1713_v46 = vadd.f32 %v1709_v49, %v1700_v50  ;;  %v1688_v54 = vadd.f32 %v1684_v52, %v1675_v51  ;;  %v2811_v59 = vsel %vm1857_vm10, %v1856_v39, %v1666_v6 }
 0x6bb   : > { %v1724_v18 = vadd.f32 %v2750_v58, %v1713_v46  ;;  %v1701_v27 = vadd.f32 %v1697_v22, %v1688_v54 }
 0x6bd   : > { %2244 = vtanh.f32 %v1724_v18  ;;  %v1714_v40 = vadd.f32 %v1710_v56, %v1701_v27 }
 0x6be   : > { %v2241_v5 = vpop.eup %2240 }
 0x6bf   : > { %v1757_v28 = vmul.f32 %v2241_v5, %v2018_v55  ;;  %v1736_v10 = vmul.f32 %v2241_v5, %v2017_v32  ;;  %v1725_v61 = vadd.f32 %v2750_v58, %v1714_v40 }
 0x6c1   : > { %v1763_v23 = vsel %vm1069_vm5, %v1757_v28, 0.0  ;;  %v1742_v62 = vsel %vm1069_vm5, %v1736_v10, 0.0  ;;  %2246 = vtanh.f32 %v1725_v61 }
 0x6c2   : > { %1764 = vadd.xlane.f32.xlu1 %v1763_v23  ;;  %1743 = vadd.xlane.f32.xlu0 %v1742_v62  ;;  %v2243_v63 = vpop.eup %2242 }
 0x6c3   : > { %v1756_v0 = vmul.f32 %v2243_v63, %v2018_v55  ;;  %v1735_v1 = vmul.f32 %v2243_v63, %v2017_v32 }
 0x6c5   : > { %v1760_v3 = vsel %vm1069_vm5, %v1756_v0, 0.0  ;;  %v1739_v15 = vsel %vm1069_vm5, %v1735_v1, 0.0 }
 0x6c6   : > { %1761 = vadd.xlane.f32.xlu1 %v1760_v3  ;;  %1740 = vadd.xlane.f32.xlu0 %v1739_v15 }
 0x6ca   : > { %v2245_v4 = vpop.eup %2244 }
 0x6cb   : > { %v1758_v12 = vmul.f32 %v2245_v4, %v2018_v55  ;;  %v1737_v9 = vmul.f32 %v2245_v4, %v2017_v32 }
 0x6cd   : > { %v1766_v26 = vsel %vm1069_vm5, %v1758_v12, 0.0  ;;  %v1745_v11 = vsel %vm1069_vm5, %v1737_v9, 0.0 }
 0x6ce   : > { %1767 = vadd.xlane.f32.xlu1 %v1766_v26  ;;  %1746 = vadd.xlane.f32.xlu0 %v1745_v11  ;;  %v2247_v58 = vpop.eup %2246 }
 0x6cf   : > { %v1759_v13 = vmul.f32 %v2247_v58, %v2018_v55  ;;  %v1738_v14 = vmul.f32 %v2247_v58, %v2017_v32 }
 0x6d1   : > { %v1769_v19 = vsel %vm1069_vm5, %v1759_v13, 0.0  ;;  %v1748_v21 = vsel %vm1069_vm5, %v1738_v14, 0.0  ;;  %vm1862_vm5 = vcmask 31744   ;;  %v1858_v14 = vsel %vm1857_vm10, %v2757_v60, %v2745_v57 }
 0x6d2   : > { %1770 = vadd.xlane.f32.xlu1 %v1769_v19  ;;  %1749 = vadd.xlane.f32.xlu0 %v1748_v21  ;;  %v1859_v21 = vsel %vm1857_vm10, %v2730_v47, %v2713_v38 }
 0x74b   : > { %v1765_v25 = vpop.xlane.xlu1 %1764  ;;  %v1744_v2 = vpop.xlane.xlu0 %1743 }
 0x74c   : > { %v1774_v30 = vsel %vm1772_vm12, %v1744_v2, %v1765_v25  ;;  %v1860_v2 = vsel %vm1857_vm10, %v2787_v41, %v2774_v33 }
 0x74d   : > { %v1785_v34 = vadd.f32 %v2019_v24, %v1774_v30 }
 0x74f   : > { %v1792_v7 = vsel %vm1788_vm13, %v1785_v34, -inf  ;;  %v1762_v35 = vpop.xlane.xlu1 %1761  ;;  %v1741_v36 = vpop.xlane.xlu0 %1740 }
 0x750   : > { %1793 = vmax.xlane.f32.xlu1 %v1792_v7  ;;  %v1773_v8 = vsel %vm1772_vm12, %v1741_v36, %v1762_v35 }
 0x751   : > { %v1784_v37 = vadd.f32 %v2019_v24, %v1773_v8 }
 0x753   : > { %v1789_v29 = vsel %vm1788_vm13, %v1784_v37, -inf }
 0x754   : > { %1790 = vmax.xlane.f32.xlu0 %v1789_v29 }
 0x757   : > { %v1768_v48 = vpop.xlane.xlu1 %1767  ;;  %v1747_v20 = vpop.xlane.xlu0 %1746 }
 0x758   : > { %v1775_v42 = vsel %vm1772_vm12, %v1747_v20, %v1768_v48 }
 0x759   : > { %v1786_v43 = vadd.f32 %v2019_v24, %v1775_v42 }
 0x75b   : > { %v1795_v17 = vsel %vm1788_vm13, %v1786_v43, -inf  ;;  %v1771_v44 = vpop.xlane.xlu1 %1770  ;;  %v1750_v45 = vpop.xlane.xlu0 %1749 }
 0x75c   : > { %1796 = vmax.xlane.f32.xlu0 %v1795_v17  ;;  %v1776_v16 = vsel %vm1772_vm12, %v1750_v45, %v1771_v44 }
 0x75d   : > { %v1787_v49 = vadd.f32 %v2019_v24, %v1776_v16 }
 0x75f   : > { %v1798_v31 = vsel %vm1788_vm13, %v1787_v49, -inf }
 0x760   : > { %1799 = vmax.xlane.f32.xlu1 %v1798_v31 }
 0x7d9   : > { %v1794_v50 = vpop.xlane.xlu1 %1793 }
 0x7da   : > { %v1802_v51 = vsub.f32 %v1785_v34, %v1794_v50 }
 0x7dc   : > { %v1807_v52 = vmul.f32 1.442695, %v1802_v51 }
 0x7dd   : > { %v1791_v53 = vpop.xlane.xlu0 %1790 }
 0x7de   : > { %2248 = vpow2.f32 %v1807_v52  ;;  %v1801_v46 = vsub.f32 %v1784_v37, %v1791_v53 }
 0x7e0   : > { %v1805_v6 = vmul.f32 1.442695, %v1801_v46 }
 0x7e2   : > { %2250 = vpow2.f32 %v1805_v6 }
 0x7e5   : > { %v1797_v39 = vpop.xlane.xlu0 %1796 }
 0x7e6   : > { %v1803_v54 = vsub.f32 %v1786_v43, %v1797_v39 }
 0x7e8   : > { %v1809_v22 = vmul.f32 1.442695, %v1803_v54 }
 0x7e9   : > { %v1800_v32 = vpop.xlane.xlu1 %1799 }
 0x7ea   : > { %2252 = vpow2.f32 %v1809_v22  ;;  %v1804_v5 = vsub.f32 %v1787_v49, %v1800_v32 }
 0x7eb   : > { %v2249_v55 = vpop.eup %2248 }
 0x7ec   : > { %v1816_v18 = vsel %vm1788_vm13, %v2249_v55, 0.0  ;;  %v1811_v27 = vmul.f32 1.442695, %v1804_v5 }
 0x7ed   : > { %1817 = vadd.xlane.f32.xlu1 %v1816_v18 }
 0x7ee   : > { %2254 = vpow2.f32 %v1811_v27 }
 0x7ef   : > { %v2251_v56 = vpop.eup %2250 }
 0x7f0   : > { %v1813_v28 = vsel %vm1788_vm13, %v2251_v56, 0.0 }
 0x7f1   : > { %1814 = vadd.xlane.f32.xlu0 %v1813_v28 }
 0x7f7   : > { %v2253_v10 = vpop.eup %2252 }
 0x7f8   : > { %v1819_v40 = vsel %vm1788_vm13, %v2253_v10, 0.0 }
 0x7f9   : > { %1820 = vadd.xlane.f32.xlu0 %v1819_v40 }
 0x7fb   : > { %v2255_v23 = vpop.eup %2254 }
 0x7fc   : > { %v1822_v62 = vsel %vm1788_vm13, %v2255_v23, 0.0 }
 0x7fd   : > { %1823 = vadd.xlane.f32.xlu1 %v1822_v62 }
 0x876   : > { %v1818_v61 = vpop.xlane.xlu1 %1817 }
 0x877   : > { %2256 = vrcp.f32 %v1818_v61 }
 0x87a   : > { %v1815_v63 = vpop.xlane.xlu0 %1814 }
 0x87b   : > { %2258 = vrcp.f32 %v1815_v63 }
 0x882   : > { %v1821_v1 = vpop.xlane.xlu0 %1820 }
 0x883   : > { %2260 = vrcp.f32 %v1821_v1 }
 0x884   : > { %v2257_v0 = vpop.eup %2256 }
 0x885   : > { %v1828_v3 = vmul.f32 %v2257_v0, %v2249_v55 }
 0x886   : > { %v1824_v4 = vpop.xlane.xlu1 %1823 }
 0x887   : > { %1839 = vrot.lane.b32.xlu1 %v1828_v3, %s2273_s5  ;;  %2262 = vrcp.f32 %v1824_v4 }
 0x888   : > { %v2259_v15 = vpop.eup %2258 }
 0x889   : > { %v1826_v12 = vmul.f32 %v2259_v15, %v2251_v56 }
 0x88b   : > { %1837 = vrot.lane.b32.xlu0 %v1826_v12, %s2273_s5 }
 0x890   : > { %v2261_v9 = vpop.eup %2260 }
 0x891   : > { %v1830_v26 = vmul.f32 %v2261_v9, %v2253_v10 }
 0x893   : > { %1841 = vrot.lane.b32.xlu1 %v1830_v26, %s2273_s5 }
 0x894   : > { %v2263_v11 = vpop.eup %2262 }
 0x895   : > { %v1832_v58 = vmul.f32 %v2263_v11, %v2255_v23 }
 0x897   : > { %1843 = vrot.lane.b32.xlu0 %v1832_v58, %s2273_s5 }
 0x8f9   : > { %v1840_v13 = vpop.permute.xlu1 %1839 }
 0x8fa   : > { %v1864_v25 = vsel %vm1862_vm5, %v1859_v21, %v1840_v13 }
 0x8fb   : > { %1869 = vst.msk [vmem:[%s701_s25 + $0x8] sm:$0xff] %vm1867_vm11, %v1864_v25 }
 0x8fd   : > { %v1838_v19 = vpop.permute.xlu0 %1837 }
 0x8fe   : > { %v1863_v24 = vsel %vm1862_vm5, %v1858_v14, %v1838_v19 }
 0x8ff   : > { %1868 = vst.msk [vmem:[%s701_s25] sm:$0xff] %vm1867_vm11, %v1863_v24 }
 0x905   : > { %v1842_v30 = vpop.permute.xlu1 %1841 }
 0x906   : > { %v1865_v34 = vsel %vm1862_vm5, %v1860_v2, %v1842_v30 }
 0x907   : > { %1870 = vst.msk [vmem:[%s701_s25 + $0x10] sm:$0xff] %vm1867_vm11, %v1865_v34 }
 0x909   : > { %v1844_v57 = vpop.permute.xlu0 %1843 }
 0x90a   : > { %v1866_v60 = vsel %vm1862_vm5, %v2811_v59, %v1844_v57 }
 0x90b   : > { %1871 = vst.msk [vmem:[%s701_s25 + $0x18] sm:$0xff] %vm1867_vm11, %v1866_v60 }
 0x90c PF: > { %s35_s29 = sadd.s32 1, %s2270_s29  }
 0x90d   : > { %p32_p4 = scmp.ge.s32.totalorder %s35_s29, 4  }
 0x90f   :  { %34 = sbr.rel (!%p32_p4) target bundleno = 8 (0x8), region = 146 }

</bundles_post_ra>
